<compile_context>
chip_gen: v7x
topology: tpu7x:2x2x1
jax: 0.10.0
libtpu: 0.0.40
codegen_flags: <defaults>
</compile_context>

<pallas_src>
import functools

import jax
import jax.numpy as jnp
from jax import lax
from jax.experimental import pallas as pl
from jax.experimental.pallas import tpu as pltpu

D_IN = 1000
D_PAD = 1024          # contraction dim padded to 8*128 for aligned MXU K-tiles
HID = 64
GATES = 4 * HID       # 256 gate columns, PyTorch order [i, f, g, o]
N_OUT = 10
N_PAD = 128           # lane-dense output tile; wrapper slices back to 10


def lstm_head_kernel(x_ref, wih_ref, whh_ref, b_ref, wout_ref, bout_ref,
                     y_ref, gx_ref, *, seq_len, batch):
    # ---- Hoisted input projection (all timesteps, one big matmul) -----------
    # gates_x = x @ W_ih^T + (b_ih + b_hh)   -> (T*B, 4H), kept in VMEM scratch.
    gx_ref[...] = (
        jnp.dot(x_ref[...], wih_ref[...], preferred_element_type=jnp.float32)
        + b_ref[...]
    )

    # ---- Sequential recurrence: only h @ W_hh^T + elementwise per step ------
    def step(t, carry):
        h, c = carry
        off = pl.multiple_of(t * batch, batch)            # sublane-aligned start
        gates = gx_ref[pl.ds(off, batch), :] + jnp.dot(
            h, whh_ref[...], preferred_element_type=jnp.float32)
        # Full-width transcendentals (EUP is a separate VLIW slot -> ~free),
        # then slice the four 64-lane gates.
        sig = jax.nn.sigmoid(gates)
        tnh = jnp.tanh(gates)
        i_g = sig[:, 0 * HID:1 * HID]
        f_g = sig[:, 1 * HID:2 * HID]
        g_g = tnh[:, 2 * HID:3 * HID]
        o_g = sig[:, 3 * HID:4 * HID]
        c_new = f_g * c + i_g * g_g
        h_new = o_g * jnp.tanh(c_new)
        return (h_new, c_new)

    h0 = jnp.zeros((batch, HID), jnp.float32)
    c0 = jnp.zeros((batch, HID), jnp.float32)
    h_n, _ = lax.fori_loop(0, seq_len, step, (h0, c0), unroll=True)

    # ---- Linear head on h_n[-1], lane-dense (padded to 128 columns) ---------
    y_ref[...] = (
        jnp.dot(h_n, wout_ref[...], preferred_element_type=jnp.float32)
        + bout_ref[...]
    ).astype(y_ref.dtype)


def rnn_forward(x_btd, w_ih, w_hh, b_ih, b_hh, w_out, b_out):
    """x_btd: (B, T, D_in) float32 (batch_first, like the PyTorch module)."""
    B, T, D = x_btd.shape
    assert D == D_IN
    assert B % 8 == 0, "batch must be sublane-aligned for the flattened layout"

    # Time-major, zero-pad features 1000 -> 1024, flatten time*batch rows.
    x_tbd = jnp.transpose(x_btd, (1, 0, 2))                            # (T, B, D)
    x_flat = jnp.pad(x_tbd, ((0, 0), (0, 0), (0, D_PAD - D_IN)))
    x_flat = x_flat.reshape(T * B, D_PAD)                              # (T*B, 1024)

    # Pre-transpose weights; zero-pad W_ih^T rows to match the padded features.
    wih_t = jnp.pad(jnp.transpose(w_ih), ((0, D_PAD - D_IN), (0, 0)))  # (1024, 4H)
    whh_t = jnp.transpose(w_hh)                                        # (H, 4H)
    bias = (b_ih + b_hh).reshape(1, GATES)                             # (1, 4H)
    wout_t = jnp.pad(jnp.transpose(w_out), ((0, 0), (0, N_PAD - N_OUT)))  # (H, 128)
    bout = jnp.pad(b_out, (0, N_PAD - N_OUT)).reshape(1, N_PAD)           # (1, 128)

    # NOTE: on v6e/v7x, casting x_flat / wih_t / whh_t to bfloat16 (keeping
    # preferred_element_type=jnp.float32) roughly doubles MXU throughput and
    # halves weight traffic; kept f32 here to match the f32 reference tightly.

    kernel = functools.partial(lstm_head_kernel, seq_len=T, batch=B)

    grid_spec = pltpu.PrefetchScalarGridSpec(
        num_scalar_prefetch=0,
        grid=(1,),     # single invocation: whole working set (~1.5 MB) fits VMEM
        in_specs=[
            pl.BlockSpec((T * B, D_PAD), lambda i: (0, 0)),   # x, all timesteps
            pl.BlockSpec((D_PAD, GATES), lambda i: (0, 0)),   # W_ih^T (padded)
            pl.BlockSpec((HID, GATES), lambda i: (0, 0)),     # W_hh^T
            pl.BlockSpec((1, GATES), lambda i: (0, 0)),       # b_ih + b_hh
            pl.BlockSpec((HID, N_PAD), lambda i: (0, 0)),     # W_out^T (padded)
            pl.BlockSpec((1, N_PAD), lambda i: (0, 0)),       # b_out (padded)
        ],
        out_specs=pl.BlockSpec((B, N_PAD), lambda i: (0, 0)),
        scratch_shapes=[
            pltpu.VMEM((T * B, GATES), jnp.float32),   # gates_x for all steps
        ],
    )

    y_pad = pl.pallas_call(
        kernel,
        out_shape=jax.ShapeDtypeStruct((B, N_PAD), jnp.float32),
        grid_spec=grid_spec,
        compiler_params=pltpu.CompilerParams(
            dimension_semantics=("arbitrary",),
        ),
    )(x_flat, wih_t, whh_t, bias, wout_t, bout)

    return y_pad[:, :N_OUT]


def rnn_forward_ref(x_btd, w_ih, w_hh, b_ih, b_hh, w_out, b_out):
    """Pure-JAX reference (matches PyTorch LSTM semantics)."""
    B, T, _ = x_btd.shape

    def step(carry, x_t):
        h, c = carry
        gates = x_t @ w_ih.T + h @ w_hh.T + b_ih + b_hh
        i_g = jax.nn.sigmoid(gates[:, 0 * HID:1 * HID])
        f_g = jax.nn.sigmoid(gates[:, 1 * HID:2 * HID])
        g_g = jnp.tanh(gates[:, 2 * HID:3 * HID])
        o_g = jax.nn.sigmoid(gates[:, 3 * HID:4 * HID])
        c = f_g * c + i_g * g_g
        h = o_g * jnp.tanh(c)
        return (h, c), None

    h0 = jnp.zeros((B, HID), jnp.float32)
    c0 = jnp.zeros((B, HID), jnp.float32)
    (h_n, _), _ = jax.lax.scan(step, (h0, c0), jnp.transpose(x_btd, (1, 0, 2)))
    return h_n @ w_out.T + b_out


if __name__ == "__main__":
    B, T = 8, 8  # small batch/sequence; B=8 keeps the sublane dim aligned

    key = jax.random.PRNGKey(0)
    kx, k1, k2, k3, k4, k5, k6 = jax.random.split(key, 7)

    bound = 1.0 / jnp.sqrt(HID)  # PyTorch LSTM/Linear init scale
    x = jax.random.normal(kx, (B, T, D_IN), jnp.float32)
    w_ih = jax.random.uniform(k1, (4 * HID, D_IN), jnp.float32, -bound, bound)
    w_hh = jax.random.uniform(k2, (4 * HID, HID), jnp.float32, -bound, bound)
    b_ih = jax.random.uniform(k3, (4 * HID,), jnp.float32, -bound, bound)
    b_hh = jax.random.uniform(k4, (4 * HID,), jnp.float32, -bound, bound)
    w_out = jax.random.uniform(k5, (N_OUT, HID), jnp.float32, -bound, bound)
    b_out = jax.random.uniform(k6, (N_OUT,), jnp.float32, -bound, bound)

    y = rnn_forward(x, w_ih, w_hh, b_ih, b_hh, w_out, b_out)
    y = jax.block_until_ready(y)
    assert y.shape == (B, N_OUT)

    y_ref = rnn_forward_ref(x, w_ih, w_hh, b_ih, b_hh, w_out, b_out)
    assert jnp.allclose(y, y_ref, rtol=1e-4, atol=1e-4), "mismatch vs JAX reference"

    print("KERNEL_OK")
</pallas_src>

<mosaic_0001>
module attributes {stable_mosaic.version = 11 : i64} {
  func.func @lstm_head_kernel(%arg0: i32, %arg1: memref<64x1024xf32, #tpu.memory_space<vmem>>, %arg2: memref<1024x256xf32, #tpu.memory_space<vmem>>, %arg3: memref<64x256xf32, #tpu.memory_space<vmem>>, %arg4: memref<1x256xf32, #tpu.memory_space<vmem>>, %arg5: memref<64x128xf32, #tpu.memory_space<vmem>>, %arg6: memref<1x128xf32, #tpu.memory_space<vmem>>, %arg7: memref<8x128xf32, #tpu.memory_space<vmem>>, %arg8: memref<64x256xf32, #tpu.memory_space<vmem>>) attributes {dimension_semantics = [#tpu.dimension_semantics<arbitrary>], iteration_bounds = array<i64: 1>, scalar_prefetch = 0 : i64, scratch_operands = 1 : i64, tpu.core_type = #tpu.core_type<tc>, window_params = [{pipeline_mode = #tpu.pipeline_mode<synchronous>, transform_indices = @transform_0, window_bounds = array<i64: 64, 1024>}, {pipeline_mode = #tpu.pipeline_mode<synchronous>, transform_indices = @transform_1, window_bounds = array<i64: 1024, 256>}, {pipeline_mode = #tpu.pipeline_mode<synchronous>, transform_indices = @transform_2, window_bounds = array<i64: 64, 256>}, {pipeline_mode = #tpu.pipeline_mode<synchronous>, transform_indices = @transform_3, window_bounds = array<i64: 1, 256>}, {pipeline_mode = #tpu.pipeline_mode<synchronous>, transform_indices = @transform_4, window_bounds = array<i64: 64, 128>}, {pipeline_mode = #tpu.pipeline_mode<synchronous>, transform_indices = @transform_5, window_bounds = array<i64: 1, 128>}, {pipeline_mode = #tpu.pipeline_mode<synchronous>, transform_indices = @transform_6, window_bounds = array<i64: 8, 128>}]} {
    %c0 = arith.constant 0 : index
    %c0_0 = arith.constant 0 : index
    %0 = vector.load %arg1[%c0, %c0_0] : memref<64x1024xf32, #tpu.memory_space<vmem>>, vector<64x1024xf32>
    %c0_1 = arith.constant 0 : index
    %c0_2 = arith.constant 0 : index
    %1 = vector.load %arg2[%c0_1, %c0_2] : memref<1024x256xf32, #tpu.memory_space<vmem>>, vector<1024x256xf32>
    %cst = arith.constant dense<0.000000e+00> : vector<64x256xf32>
    %2 = tpu.matmul %0, %1, %cst {dimension_numbers = #tpu.dot_dimension_numbers<[1], [0], [0], [1], [0, 0, 1, 1], [], []>} : vector<64x1024xf32>, vector<1024x256xf32>, vector<64x256xf32> -> vector<64x256xf32>
    %c0_3 = arith.constant 0 : index
    %c0_4 = arith.constant 0 : index
    %3 = vector.load %arg4[%c0_3, %c0_4] : memref<1x256xf32, #tpu.memory_space<vmem>>, vector<1x256xf32>
    %4 = vector.broadcast %3 : vector<1x256xf32> to vector<64x256xf32>
    %5 = arith.addf %2, %4 : vector<64x256xf32>
    %c0_5 = arith.constant 0 : index
    %c0_6 = arith.constant 0 : index
    %6 = vector.load %arg8[%c0_5, %c0_6] : memref<64x256xf32, #tpu.memory_space<vmem>>, vector<64x256xf32>
    tpu.vector_store %arg8[%c0_5, %c0_6], %5 {strides = array<i32>} : memref<64x256xf32, #tpu.memory_space<vmem>>, vector<64x256xf32>,
    %cst_7 = arith.constant 0.000000e+00 : f32
    %7 = vector.broadcast %cst_7 : f32 to vector<8x64xf32>
    %cst_8 = arith.constant 0.000000e+00 : f32
    %8 = vector.broadcast %cst_8 : f32 to vector<8x64xf32>
    %c0_i32 = arith.constant 0 : i32
    %c8_i32 = arith.constant 8 : i32
    %9 = arith.muli %c0_i32, %c8_i32 : i32
    %10 = tpu.assume_multiple %9, 8 : i32
    %11 = arith.index_cast %10 : i32 to index
    %c0_9 = arith.constant 0 : index
    %12 = vector.load %arg8[%11, %c0_9] : memref<64x256xf32, #tpu.memory_space<vmem>>, vector<8x256xf32>
    %c0_10 = arith.constant 0 : index
    %c0_11 = arith.constant 0 : index
    %13 = vector.load %arg3[%c0_10, %c0_11] : memref<64x256xf32, #tpu.memory_space<vmem>>, vector<64x256xf32>
    %cst_12 = arith.constant dense<0.000000e+00> : vector<8x256xf32>
    %14 = tpu.matmul %7, %13, %cst_12 {dimension_numbers = #tpu.dot_dimension_numbers<[1], [0], [0], [1], [0, 0, 1, 1], [], []>} : vector<8x64xf32>, vector<64x256xf32>, vector<8x256xf32> -> vector<8x256xf32>
    %15 = arith.addf %12, %14 : vector<8x256xf32>
    %16 = arith.negf %15 : vector<8x256xf32>
    %17 = math.exp %16 : vector<8x256xf32>
    %cst_13 = arith.constant 1.000000e+00 : f32
    %18 = vector.broadcast %cst_13 : f32 to vector<8x256xf32>
    %19 = arith.addf %18, %17 : vector<8x256xf32>
    %20 = arith.divf %18, %19 : vector<8x256xf32>
    %21 = math.tanh %15 : vector<8x256xf32>
    %22 = vector.extract_strided_slice %20 {offsets = [0, 0], sizes = [8, 64], strides = [1, 1]} : vector<8x256xf32> to vector<8x64xf32>
    %23 = vector.extract_strided_slice %20 {offsets = [0, 64], sizes = [8, 64], strides = [1, 1]} : vector<8x256xf32> to vector<8x64xf32>
    %24 = vector.extract_strided_slice %21 {offsets = [0, 128], sizes = [8, 64], strides = [1, 1]} : vector<8x256xf32> to vector<8x64xf32>
    %25 = vector.extract_strided_slice %20 {offsets = [0, 192], sizes = [8, 64], strides = [1, 1]} : vector<8x256xf32> to vector<8x64xf32>
    %26 = arith.mulf %23, %8 : vector<8x64xf32>
    %27 = arith.mulf %22, %24 : vector<8x64xf32>
    %28 = arith.addf %26, %27 : vector<8x64xf32>
    %29 = math.tanh %28 : vector<8x64xf32>
    %30 = arith.mulf %25, %29 : vector<8x64xf32>
    %c1_i32 = arith.constant 1 : i32
    %c8_i32_14 = arith.constant 8 : i32
    %31 = arith.muli %c1_i32, %c8_i32_14 : i32
    %32 = tpu.assume_multiple %31, 8 : i32
    %33 = arith.index_cast %32 : i32 to index
    %c0_15 = arith.constant 0 : index
    %34 = vector.load %arg8[%33, %c0_15] : memref<64x256xf32, #tpu.memory_space<vmem>>, vector<8x256xf32>
    %c0_16 = arith.constant 0 : index
    %c0_17 = arith.constant 0 : index
    %35 = vector.load %arg3[%c0_16, %c0_17] : memref<64x256xf32, #tpu.memory_space<vmem>>, vector<64x256xf32>
    %cst_18 = arith.constant dense<0.000000e+00> : vector<8x256xf32>
    %36 = tpu.matmul %30, %35, %cst_18 {dimension_numbers = #tpu.dot_dimension_numbers<[1], [0], [0], [1], [0, 0, 1, 1], [], []>} : vector<8x64xf32>, vector<64x256xf32>, vector<8x256xf32> -> vector<8x256xf32>
    %37 = arith.addf %34, %36 : vector<8x256xf32>
    %38 = arith.negf %37 : vector<8x256xf32>
    %39 = math.exp %38 : vector<8x256xf32>
    %cst_19 = arith.constant 1.000000e+00 : f32
    %40 = vector.broadcast %cst_19 : f32 to vector<8x256xf32>
    %41 = arith.addf %40, %39 : vector<8x256xf32>
    %42 = arith.divf %40, %41 : vector<8x256xf32>
    %43 = math.tanh %37 : vector<8x256xf32>
    %44 = vector.extract_strided_slice %42 {offsets = [0, 0], sizes = [8, 64], strides = [1, 1]} : vector<8x256xf32> to vector<8x64xf32>
    %45 = vector.extract_strided_slice %42 {offsets = [0, 64], sizes = [8, 64], strides = [1, 1]} : vector<8x256xf32> to vector<8x64xf32>
    %46 = vector.extract_strided_slice %43 {offsets = [0, 128], sizes = [8, 64], strides = [1, 1]} : vector<8x256xf32> to vector<8x64xf32>
    %47 = vector.extract_strided_slice %42 {offsets = [0, 192], sizes = [8, 64], strides = [1, 1]} : vector<8x256xf32> to vector<8x64xf32>
    %48 = arith.mulf %45, %28 : vector<8x64xf32>
    %49 = arith.mulf %44, %46 : vector<8x64xf32>
    %50 = arith.addf %48, %49 : vector<8x64xf32>
    %51 = math.tanh %50 : vector<8x64xf32>
    %52 = arith.mulf %47, %51 : vector<8x64xf32>
    %c2_i32 = arith.constant 2 : i32
    %c8_i32_20 = arith.constant 8 : i32
    %53 = arith.muli %c2_i32, %c8_i32_20 : i32
    %54 = tpu.assume_multiple %53, 8 : i32
    %55 = arith.index_cast %54 : i32 to index
    %c0_21 = arith.constant 0 : index
    %56 = vector.load %arg8[%55, %c0_21] : memref<64x256xf32, #tpu.memory_space<vmem>>, vector<8x256xf32>
    %c0_22 = arith.constant 0 : index
    %c0_23 = arith.constant 0 : index
    %57 = vector.load %arg3[%c0_22, %c0_23] : memref<64x256xf32, #tpu.memory_space<vmem>>, vector<64x256xf32>
    %cst_24 = arith.constant dense<0.000000e+00> : vector<8x256xf32>
    %58 = tpu.matmul %52, %57, %cst_24 {dimension_numbers = #tpu.dot_dimension_numbers<[1], [0], [0], [1], [0, 0, 1, 1], [], []>} : vector<8x64xf32>, vector<64x256xf32>, vector<8x256xf32> -> vector<8x256xf32>
    %59 = arith.addf %56, %58 : vector<8x256xf32>
    %60 = arith.negf %59 : vector<8x256xf32>
    %61 = math.exp %60 : vector<8x256xf32>
    %cst_25 = arith.constant 1.000000e+00 : f32
    %62 = vector.broadcast %cst_25 : f32 to vector<8x256xf32>
    %63 = arith.addf %62, %61 : vector<8x256xf32>
    %64 = arith.divf %62, %63 : vector<8x256xf32>
    %65 = math.tanh %59 : vector<8x256xf32>
    %66 = vector.extract_strided_slice %64 {offsets = [0, 0], sizes = [8, 64], strides = [1, 1]} : vector<8x256xf32> to vector<8x64xf32>
    %67 = vector.extract_strided_slice %64 {offsets = [0, 64], sizes = [8, 64], strides = [1, 1]} : vector<8x256xf32> to vector<8x64xf32>
    %68 = vector.extract_strided_slice %65 {offsets = [0, 128], sizes = [8, 64], strides = [1, 1]} : vector<8x256xf32> to vector<8x64xf32>
    %69 = vector.extract_strided_slice %64 {offsets = [0, 192], sizes = [8, 64], strides = [1, 1]} : vector<8x256xf32> to vector<8x64xf32>
    %70 = arith.mulf %67, %50 : vector<8x64xf32>
    %71 = arith.mulf %66, %68 : vector<8x64xf32>
    %72 = arith.addf %70, %71 : vector<8x64xf32>
    %73 = math.tanh %72 : vector<8x64xf32>
    %74 = arith.mulf %69, %73 : vector<8x64xf32>
    %c3_i32 = arith.constant 3 : i32
    %c8_i32_26 = arith.constant 8 : i32
    %75 = arith.muli %c3_i32, %c8_i32_26 : i32
    %76 = tpu.assume_multiple %75, 8 : i32
    %77 = arith.index_cast %76 : i32 to index
    %c0_27 = arith.constant 0 : index
    %78 = vector.load %arg8[%77, %c0_27] : memref<64x256xf32, #tpu.memory_space<vmem>>, vector<8x256xf32>
    %c0_28 = arith.constant 0 : index
    %c0_29 = arith.constant 0 : index
    %79 = vector.load %arg3[%c0_28, %c0_29] : memref<64x256xf32, #tpu.memory_space<vmem>>, vector<64x256xf32>
    %cst_30 = arith.constant dense<0.000000e+00> : vector<8x256xf32>
    %80 = tpu.matmul %74, %79, %cst_30 {dimension_numbers = #tpu.dot_dimension_numbers<[1], [0], [0], [1], [0, 0, 1, 1], [], []>} : vector<8x64xf32>, vector<64x256xf32>, vector<8x256xf32> -> vector<8x256xf32>
    %81 = arith.addf %78, %80 : vector<8x256xf32>
    %82 = arith.negf %81 : vector<8x256xf32>
    %83 = math.exp %82 : vector<8x256xf32>
    %cst_31 = arith.constant 1.000000e+00 : f32
    %84 = vector.broadcast %cst_31 : f32 to vector<8x256xf32>
    %85 = arith.addf %84, %83 : vector<8x256xf32>
    %86 = arith.divf %84, %85 : vector<8x256xf32>
    %87 = math.tanh %81 : vector<8x256xf32>
    %88 = vector.extract_strided_slice %86 {offsets = [0, 0], sizes = [8, 64], strides = [1, 1]} : vector<8x256xf32> to vector<8x64xf32>
    %89 = vector.extract_strided_slice %86 {offsets = [0, 64], sizes = [8, 64], strides = [1, 1]} : vector<8x256xf32> to vector<8x64xf32>
    %90 = vector.extract_strided_slice %87 {offsets = [0, 128], sizes = [8, 64], strides = [1, 1]} : vector<8x256xf32> to vector<8x64xf32>
    %91 = vector.extract_strided_slice %86 {offsets = [0, 192], sizes = [8, 64], strides = [1, 1]} : vector<8x256xf32> to vector<8x64xf32>
    %92 = arith.mulf %89, %72 : vector<8x64xf32>
    %93 = arith.mulf %88, %90 : vector<8x64xf32>
    %94 = arith.addf %92, %93 : vector<8x64xf32>
    %95 = math.tanh %94 : vector<8x64xf32>
    %96 = arith.mulf %91, %95 : vector<8x64xf32>
    %c4_i32 = arith.constant 4 : i32
    %c8_i32_32 = arith.constant 8 : i32
    %97 = arith.muli %c4_i32, %c8_i32_32 : i32
    %98 = tpu.assume_multiple %97, 8 : i32
    %99 = arith.index_cast %98 : i32 to index
    %c0_33 = arith.constant 0 : index
    %100 = vector.load %arg8[%99, %c0_33] : memref<64x256xf32, #tpu.memory_space<vmem>>, vector<8x256xf32>
    %c0_34 = arith.constant 0 : index
    %c0_35 = arith.constant 0 : index
    %101 = vector.load %arg3[%c0_34, %c0_35] : memref<64x256xf32, #tpu.memory_space<vmem>>, vector<64x256xf32>
    %cst_36 = arith.constant dense<0.000000e+00> : vector<8x256xf32>
    %102 = tpu.matmul %96, %101, %cst_36 {dimension_numbers = #tpu.dot_dimension_numbers<[1], [0], [0], [1], [0, 0, 1, 1], [], []>} : vector<8x64xf32>, vector<64x256xf32>, vector<8x256xf32> -> vector<8x256xf32>
    %103 = arith.addf %100, %102 : vector<8x256xf32>
    %104 = arith.negf %103 : vector<8x256xf32>
    %105 = math.exp %104 : vector<8x256xf32>
    %cst_37 = arith.constant 1.000000e+00 : f32
    %106 = vector.broadcast %cst_37 : f32 to vector<8x256xf32>
    %107 = arith.addf %106, %105 : vector<8x256xf32>
    %108 = arith.divf %106, %107 : vector<8x256xf32>
    %109 = math.tanh %103 : vector<8x256xf32>
    %110 = vector.extract_strided_slice %108 {offsets = [0, 0], sizes = [8, 64], strides = [1, 1]} : vector<8x256xf32> to vector<8x64xf32>
    %111 = vector.extract_strided_slice %108 {offsets = [0, 64], sizes = [8, 64], strides = [1, 1]} : vector<8x256xf32> to vector<8x64xf32>
    %112 = vector.extract_strided_slice %109 {offsets = [0, 128], sizes = [8, 64], strides = [1, 1]} : vector<8x256xf32> to vector<8x64xf32>
    %113 = vector.extract_strided_slice %108 {offsets = [0, 192], sizes = [8, 64], strides = [1, 1]} : vector<8x256xf32> to vector<8x64xf32>
    %114 = arith.mulf %111, %94 : vector<8x64xf32>
    %115 = arith.mulf %110, %112 : vector<8x64xf32>
    %116 = arith.addf %114, %115 : vector<8x64xf32>
    %117 = math.tanh %116 : vector<8x64xf32>
    %118 = arith.mulf %113, %117 : vector<8x64xf32>
    %c5_i32 = arith.constant 5 : i32
    %c8_i32_38 = arith.constant 8 : i32
    %119 = arith.muli %c5_i32, %c8_i32_38 : i32
    %120 = tpu.assume_multiple %119, 8 : i32
    %121 = arith.index_cast %120 : i32 to index
    %c0_39 = arith.constant 0 : index
    %122 = vector.load %arg8[%121, %c0_39] : memref<64x256xf32, #tpu.memory_space<vmem>>, vector<8x256xf32>
    %c0_40 = arith.constant 0 : index
    %c0_41 = arith.constant 0 : index
    %123 = vector.load %arg3[%c0_40, %c0_41] : memref<64x256xf32, #tpu.memory_space<vmem>>, vector<64x256xf32>
    %cst_42 = arith.constant dense<0.000000e+00> : vector<8x256xf32>
    %124 = tpu.matmul %118, %123, %cst_42 {dimension_numbers = #tpu.dot_dimension_numbers<[1], [0], [0], [1], [0, 0, 1, 1], [], []>} : vector<8x64xf32>, vector<64x256xf32>, vector<8x256xf32> -> vector<8x256xf32>
    %125 = arith.addf %122, %124 : vector<8x256xf32>
    %126 = arith.negf %125 : vector<8x256xf32>
    %127 = math.exp %126 : vector<8x256xf32>
    %cst_43 = arith.constant 1.000000e+00 : f32
    %128 = vector.broadcast %cst_43 : f32 to vector<8x256xf32>
    %129 = arith.addf %128, %127 : vector<8x256xf32>
    %130 = arith.divf %128, %129 : vector<8x256xf32>
    %131 = math.tanh %125 : vector<8x256xf32>
    %132 = vector.extract_strided_slice %130 {offsets = [0, 0], sizes = [8, 64], strides = [1, 1]} : vector<8x256xf32> to vector<8x64xf32>
    %133 = vector.extract_strided_slice %130 {offsets = [0, 64], sizes = [8, 64], strides = [1, 1]} : vector<8x256xf32> to vector<8x64xf32>
    %134 = vector.extract_strided_slice %131 {offsets = [0, 128], sizes = [8, 64], strides = [1, 1]} : vector<8x256xf32> to vector<8x64xf32>
    %135 = vector.extract_strided_slice %130 {offsets = [0, 192], sizes = [8, 64], strides = [1, 1]} : vector<8x256xf32> to vector<8x64xf32>
    %136 = arith.mulf %133, %116 : vector<8x64xf32>
    %137 = arith.mulf %132, %134 : vector<8x64xf32>
    %138 = arith.addf %136, %137 : vector<8x64xf32>
    %139 = math.tanh %138 : vector<8x64xf32>
    %140 = arith.mulf %135, %139 : vector<8x64xf32>
    %c6_i32 = arith.constant 6 : i32
    %c8_i32_44 = arith.constant 8 : i32
    %141 = arith.muli %c6_i32, %c8_i32_44 : i32
    %142 = tpu.assume_multiple %141, 8 : i32
    %143 = arith.index_cast %142 : i32 to index
    %c0_45 = arith.constant 0 : index
    %144 = vector.load %arg8[%143, %c0_45] : memref<64x256xf32, #tpu.memory_space<vmem>>, vector<8x256xf32>
    %c0_46 = arith.constant 0 : index
    %c0_47 = arith.constant 0 : index
    %145 = vector.load %arg3[%c0_46, %c0_47] : memref<64x256xf32, #tpu.memory_space<vmem>>, vector<64x256xf32>
    %cst_48 = arith.constant dense<0.000000e+00> : vector<8x256xf32>
    %146 = tpu.matmul %140, %145, %cst_48 {dimension_numbers = #tpu.dot_dimension_numbers<[1], [0], [0], [1], [0, 0, 1, 1], [], []>} : vector<8x64xf32>, vector<64x256xf32>, vector<8x256xf32> -> vector<8x256xf32>
    %147 = arith.addf %144, %146 : vector<8x256xf32>
    %148 = arith.negf %147 : vector<8x256xf32>
    %149 = math.exp %148 : vector<8x256xf32>
    %cst_49 = arith.constant 1.000000e+00 : f32
    %150 = vector.broadcast %cst_49 : f32 to vector<8x256xf32>
    %151 = arith.addf %150, %149 : vector<8x256xf32>
    %152 = arith.divf %150, %151 : vector<8x256xf32>
    %153 = math.tanh %147 : vector<8x256xf32>
    %154 = vector.extract_strided_slice %152 {offsets = [0, 0], sizes = [8, 64], strides = [1, 1]} : vector<8x256xf32> to vector<8x64xf32>
    %155 = vector.extract_strided_slice %152 {offsets = [0, 64], sizes = [8, 64], strides = [1, 1]} : vector<8x256xf32> to vector<8x64xf32>
    %156 = vector.extract_strided_slice %153 {offsets = [0, 128], sizes = [8, 64], strides = [1, 1]} : vector<8x256xf32> to vector<8x64xf32>
    %157 = vector.extract_strided_slice %152 {offsets = [0, 192], sizes = [8, 64], strides = [1, 1]} : vector<8x256xf32> to vector<8x64xf32>
    %158 = arith.mulf %155, %138 : vector<8x64xf32>
    %159 = arith.mulf %154, %156 : vector<8x64xf32>
    %160 = arith.addf %158, %159 : vector<8x64xf32>
    %161 = math.tanh %160 : vector<8x64xf32>
    %162 = arith.mulf %157, %161 : vector<8x64xf32>
    %c7_i32 = arith.constant 7 : i32
    %c8_i32_50 = arith.constant 8 : i32
    %163 = arith.muli %c7_i32, %c8_i32_50 : i32
    %164 = tpu.assume_multiple %163, 8 : i32
    %165 = arith.index_cast %164 : i32 to index
    %c0_51 = arith.constant 0 : index
    %166 = vector.load %arg8[%165, %c0_51] : memref<64x256xf32, #tpu.memory_space<vmem>>, vector<8x256xf32>
    %c0_52 = arith.constant 0 : index
    %c0_53 = arith.constant 0 : index
    %167 = vector.load %arg3[%c0_52, %c0_53] : memref<64x256xf32, #tpu.memory_space<vmem>>, vector<64x256xf32>
    %cst_54 = arith.constant dense<0.000000e+00> : vector<8x256xf32>
    %168 = tpu.matmul %162, %167, %cst_54 {dimension_numbers = #tpu.dot_dimension_numbers<[1], [0], [0], [1], [0, 0, 1, 1], [], []>} : vector<8x64xf32>, vector<64x256xf32>, vector<8x256xf32> -> vector<8x256xf32>
    %169 = arith.addf %166, %168 : vector<8x256xf32>
    %170 = arith.negf %169 : vector<8x256xf32>
    %171 = math.exp %170 : vector<8x256xf32>
    %cst_55 = arith.constant 1.000000e+00 : f32
    %172 = vector.broadcast %cst_55 : f32 to vector<8x256xf32>
    %173 = arith.addf %172, %171 : vector<8x256xf32>
    %174 = arith.divf %172, %173 : vector<8x256xf32>
    %175 = math.tanh %169 : vector<8x256xf32>
    %176 = vector.extract_strided_slice %174 {offsets = [0, 0], sizes = [8, 64], strides = [1, 1]} : vector<8x256xf32> to vector<8x64xf32>
    %177 = vector.extract_strided_slice %174 {offsets = [0, 64], sizes = [8, 64], strides = [1, 1]} : vector<8x256xf32> to vector<8x64xf32>
    %178 = vector.extract_strided_slice %175 {offsets = [0, 128], sizes = [8, 64], strides = [1, 1]} : vector<8x256xf32> to vector<8x64xf32>
    %179 = vector.extract_strided_slice %174 {offsets = [0, 192], sizes = [8, 64], strides = [1, 1]} : vector<8x256xf32> to vector<8x64xf32>
    %180 = arith.mulf %177, %160 : vector<8x64xf32>
    %181 = arith.mulf %176, %178 : vector<8x64xf32>
    %182 = arith.addf %180, %181 : vector<8x64xf32>
    %183 = math.tanh %182 : vector<8x64xf32>
    %184 = arith.mulf %179, %183 : vector<8x64xf32>
    %c8_i32_56 = arith.constant 8 : i32
    %c0_57 = arith.constant 0 : index
    %c0_58 = arith.constant 0 : index
    %185 = vector.load %arg5[%c0_57, %c0_58] : memref<64x128xf32, #tpu.memory_space<vmem>>, vector<64x128xf32>
    %cst_59 = arith.constant dense<0.000000e+00> : vector<8x128xf32>
    %186 = tpu.matmul %184, %185, %cst_59 {dimension_numbers = #tpu.dot_dimension_numbers<[1], [0], [0], [1], [0, 0, 1, 1], [], []>} : vector<8x64xf32>, vector<64x128xf32>, vector<8x128xf32> -> vector<8x128xf32>
    %c0_60 = arith.constant 0 : index
    %c0_61 = arith.constant 0 : index
    %187 = vector.load %arg6[%c0_60, %c0_61] : memref<1x128xf32, #tpu.memory_space<vmem>>, vector<1x128xf32>
    %188 = vector.broadcast %187 : vector<1x128xf32> to vector<8x128xf32>
    %189 = arith.addf %186, %188 : vector<8x128xf32>
    %c0_62 = arith.constant 0 : index
    %c0_63 = arith.constant 0 : index
    %190 = vector.load %arg7[%c0_62, %c0_63] : memref<8x128xf32, #tpu.memory_space<vmem>>, vector<8x128xf32>
    tpu.vector_store %arg7[%c0_62, %c0_63], %189 {strides = array<i32>} : memref<8x128xf32, #tpu.memory_space<vmem>>, vector<8x128xf32>,
    return
  }
  func.func @transform_0(%arg0: i32) -> (i32, i32) {
    %c0_i32 = arith.constant 0 : i32
    %c0_i32_0 = arith.constant 0 : i32
    %c0_i32_1 = arith.constant 0 : i32
    return %c0_i32, %c0_i32_0 : i32, i32
  }
  func.func @transform_1(%arg0: i32) -> (i32, i32) {
    %c0_i32 = arith.constant 0 : i32
    %c0_i32_0 = arith.constant 0 : i32
    %c0_i32_1 = arith.constant 0 : i32
    return %c0_i32, %c0_i32_0 : i32, i32
  }
  func.func @transform_2(%arg0: i32) -> (i32, i32) {
    %c0_i32 = arith.constant 0 : i32
    %c0_i32_0 = arith.constant 0 : i32
    %c0_i32_1 = arith.constant 0 : i32
    return %c0_i32, %c0_i32_0 : i32, i32
  }
  func.func @transform_3(%arg0: i32) -> (i32, i32) {
    %c0_i32 = arith.constant 0 : i32
    %c0_i32_0 = arith.constant 0 : i32
    %c0_i32_1 = arith.constant 0 : i32
    return %c0_i32, %c0_i32_0 : i32, i32
  }
  func.func @transform_4(%arg0: i32) -> (i32, i32) {
    %c0_i32 = arith.constant 0 : i32
    %c0_i32_0 = arith.constant 0 : i32
    %c0_i32_1 = arith.constant 0 : i32
    return %c0_i32, %c0_i32_0 : i32, i32
  }
  func.func @transform_5(%arg0: i32) -> (i32, i32) {
    %c0_i32 = arith.constant 0 : i32
    %c0_i32_0 = arith.constant 0 : i32
    %c0_i32_1 = arith.constant 0 : i32
    return %c0_i32, %c0_i32_0 : i32, i32
  }
  func.func @transform_6(%arg0: i32) -> (i32, i32) {
    %c0_i32 = arith.constant 0 : i32
    %c0_i32_0 = arith.constant 0 : i32
    %c0_i32_1 = arith.constant 0 : i32
    return %c0_i32, %c0_i32_0 : i32, i32
  }
}

</mosaic_0001>

<bundles_post_ra>
// kernel: tpu_custom_call.1
= control target key start
LH: loop header
LB: loop body
LE: loop exit
PB: predicated region body
PF: predicated region fallthrough
CT: control target
= control target key end

     0   :  { %11 = vsyncpa [#allocation4], 0  ;;  %s2885_s0 = inlined_call_operand.hbm [shape: f32[64,1024], index: 0, kind: input, shape index: {}]   ;;  %s2886_s1 = inlined_call_operand.hbm [shape: f32[1024,256], index: 1, kind: input, shape index: {}]   ;;  %s2887_s2 = inlined_call_operand.hbm [shape: f32[64,256], index: 2, kind: input, shape index: {}]   ;;  %s2888_s3 = inlined_call_operand.vmem [shape: f32[1,256], index: 3, kind: input, shape index: {}]   ;;  %s2889_s4 = inlined_call_operand.hbm [shape: f32[64,128], index: 4, kind: input, shape index: {}]   ;;  %s2890_s5 = inlined_call_operand.vmem [shape: f32[1,128], index: 5, kind: input, shape index: {}]   ;;  %s2891_s6 = inlined_call_operand.hbm [shape: f32[8,128], index: 6, kind: output, shape index: {}]  }
   0x1   :  { %12 = vsyncpa [#allocation7], 0 }
   0x2   :  { %13 = vsyncpa [#allocation10], 0 }
   0x3   :  { %14 = vsyncpa [#allocation5], 0  ;;  %s2606_s21 = smov [#allocation6]   ;;  %s2488_s25 = scalar_lea.hbm %s2886_s1, 32768 }
   0x4   :  { %s32_s22 = sshll.u32 %s2606_s21, 4  ;;  %p2489_p0 = scmp.ne.s32.totalorder %s2886_s1, %s2488_s25  ;;  %s33_s22 = int_to_ptr.vmem [resolvable:$true] %s32_s22 }
   0x5   :  { %p2492_p1 = scmp.lt.u32.totalorder %s2488_s25, %s2886_s1 }
   0x7   :  { %p2494_p2 = pnand %p2492_p1, %p2489_p0 }
   0x9   :  { %2497 = shalt.err (!%p2494_p2)
}
   0xa   :  { %s2498_s30 = scalar_lea.vmem %s33_s22, 32768  ;;  %p2503_p4 = scmp.lt.s32.totalorder %s33_s22, %s33_s22 }
   0xb   :  { %p2499_p3 = scmp.ne.s32.totalorder %s33_s22, %s2498_s30  ;;  %p2504_p5 = scmp.lt.s32.totalorder %s2498_s30, %s2498_s30 }
   0xd   :  { %p2505_p6 = por %p2504_p5, %p2503_p4 }
   0xf   :  { %p2506_p7 = pnand %p2505_p6, %p2499_p3 }
  0x11   :  { %2509 = shalt.err (!%p2506_p7)
}
  0x12   :  { %s2607_s7 = smov 256   ;;  %s2608_s8 = smov 16  }
  0x13   :  { %38 = dma.hbm_to_vmem [thread:$0]  %s2886_s1, 32768, %s33_s22, [#allocation7], %s2607_s7, %s2607_s7, %s2608_s8  }
  0x14   :  { %s2609_s11 = smov [#allocation3]   ;;  %s2510_s15 = scalar_lea.hbm %s2885_s0, 8192 }
  0x15   :  { %s20_s12 = sshll.u32 %s2609_s11, 4  ;;  %p2511_p8 = scmp.ne.s32.totalorder %s2885_s0, %s2510_s15  ;;  %s21_s12 = int_to_ptr.vmem [resolvable:$true] %s20_s12 }
  0x16   :  { %p2514_p9 = scmp.lt.u32.totalorder %s2510_s15, %s2885_s0 }
  0x18   :  { %p2516_p10 = pnand %p2514_p9, %p2511_p8 }
  0x1a   :  { %2519 = shalt.err (!%p2516_p10)
}
  0x1b   :  { %s2520_s20 = scalar_lea.vmem %s21_s12, 8192  ;;  %p2525_p12 = scmp.lt.s32.totalorder %s21_s12, %s21_s12 }
  0x1c   :  { %p2521_p11 = scmp.ne.s32.totalorder %s21_s12, %s2520_s20  ;;  %p2526_p13 = scmp.lt.s32.totalorder %s2520_s20, %s2520_s20 }
  0x1e   :  { %p2527_p0 = por %p2526_p13, %p2525_p12 }
  0x20   :  { %p2528_p1 = pnand %p2527_p0, %p2521_p11 }
  0x22   :  { %2531 = shalt.err (!%p2528_p1)
}
  0x23   :  { %s2610_s1 = smov 1024   ;;  %s2611_s21 = smov 64  }
  0x24   :  { %26 = dma.hbm_to_vmem [thread:$0]  %s2885_s0, 8192, %s21_s12, [#allocation4], %s2610_s1, %s2610_s1, %s2611_s21  }
  0x25   :  { %s2612_s24 = smov [#allocation8]   ;;  %s2613_s26 = smov [#allocation9]  }
  0x26   :  { %s44_s25 = sshll.u32 %s2612_s24, 4  ;;  %s58_s27 = sshll.u32 %s2613_s26, 4  ;;  %s45_s25 = int_to_ptr.vmem [resolvable:$true] %s44_s25  ;;  %s2683_s27 = int_to_ptr.vmem [resolvable:$true] %s58_s27 }
  0x27   :  { %s2532_s30 = scalar_lea.hbm %s2887_s2, 2048 }
  0x28   :  { %p2533_p2 = scmp.ne.s32.totalorder %s2887_s2, %s2532_s30  ;;  %p2536_p3 = scmp.lt.u32.totalorder %s2532_s30, %s2887_s2 }
  0x2a   :  { %p2538_p4 = pnand %p2536_p3, %p2533_p2 }
  0x2c   :  { %2541 = shalt.err (!%p2538_p4)
}
  0x2d   :  { %s2542_s0 = scalar_lea.vmem %s45_s25, 2048  ;;  %p2547_p6 = scmp.lt.s32.totalorder %s45_s25, %s45_s25 }
  0x2e   :  { %p2543_p5 = scmp.ne.s32.totalorder %s45_s25, %s2542_s0  ;;  %p2548_p7 = scmp.lt.s32.totalorder %s2542_s0, %s2542_s0 }
  0x30   :  { %p2549_p8 = por %p2548_p7, %p2547_p6 }
  0x32   :  { %p2550_p9 = pnand %p2549_p8, %p2543_p5 }
  0x34   :  { %2553 = shalt.err (!%p2550_p9)
}
  0x35   :  { %50 = dma.hbm_to_vmem [thread:$0]  %s2887_s2, 2048, %s45_s25, [#allocation7], %s2607_s7, %s2607_s7, %s2608_s8  }
  0x36   :  { %s2554_s17 = scalar_lea.hbm %s2889_s4, 1024 }
  0x37   :  { %p2555_p10 = scmp.ne.s32.totalorder %s2889_s4, %s2554_s17  ;;  %p2558_p11 = scmp.lt.u32.totalorder %s2554_s17, %s2889_s4 }
  0x39   :  { %p2560_p12 = pnand %p2558_p11, %p2555_p10 }
  0x3b   :  { %2563 = shalt.err (!%p2560_p12)
}
  0x3c   :  { %s2564_s22 = scalar_lea.vmem %s2683_s27, 1024  ;;  %p2569_p0 = scmp.lt.s32.totalorder %s2683_s27, %s2683_s27 }
  0x3d   :  { %p2565_p13 = scmp.ne.s32.totalorder %s2683_s27, %s2564_s22  ;;  %p2570_p1 = scmp.lt.s32.totalorder %s2564_s22, %s2564_s22 }
  0x3f   :  { %p2571_p2 = por %p2570_p1, %p2569_p0 }
  0x41   :  { %p2572_p3 = pnand %p2571_p2, %p2565_p13 }
  0x43   :  { %2575 = shalt.err (!%p2572_p3)
}
  0x44   :  { %s2614_s2 = smov 128   ;;  %s2615_s7 = smov 8  }
  0x45   :  { %64 = dma.hbm_to_vmem [thread:$0]  %s2889_s4, 1024, %s2683_s27, [#allocation10], %s2614_s2, %s2614_s2, %s2615_s7  }
  0x46   :  { %2598 = dma.done.wait [#allocation4], 8192  }
  0x47   :  { %2599 = vsyncadd [#allocation4], 4294959104 }
  0x48   :  { %2600 = dma.done.wait [#allocation7], 34816  }
  0x49   :  { %2601 = vsyncadd [#allocation7], 4294932480 }
  0x4a   :  { %2602 = dma.done.wait [#allocation10], 1024  }
  0x4b   :  { %2603 = vsyncadd [#allocation10], 4294966272  ;;  %v144_v0 = vld [vmem:[#allocation6 + $0x8] sm:$0xff]  ;;  %v146_v1 = vld [vmem:[#allocation6 + $0x18] sm:$0xff]  ;;  %vm900_vm0 = vcmask 523264   ;;  %vm2618_vm1 = vmmov 0  }
  0x4c   :  { %v143_v2 = vld [vmem:[#allocation6] sm:$0xff]  ;;  %v1902_v3 = vpack.c.bf16 %v146_v1, %v144_v0  ;;  %v145_v4 = vld [vmem:[#allocation6 + $0x10] sm:$0xff]  ;;  %v148_v5 = vld [vmem:[#allocation6 + $0x28] sm:$0xff]  ;;  %s2619_s26 = smov [#allocation11]  }
  0x4d   :  { %v150_v6 = vld [vmem:[#allocation6 + $0x38] sm:$0xff]  ;;  %v1904_v7 = vpack.c.bf16 %v145_v4, %v143_v2  ;;  %v147_v9 = vld [vmem:[#allocation6 + $0x20] sm:$0xff]  ;;  %v149_v10 = vld [vmem:[#allocation6 + $0x30] sm:$0xff]  ;;  %s1831_s27 = sshll.u32 %s2619_s26, 4  ;;  %s1832_s27 = int_to_ptr.vmem [resolvable:$true] %s1831_s27 }
  0x4e   :  { %v1906_v8 = vpack.c.bf16 %v150_v6, %v148_v5  ;;  %v152_v11 = vld [vmem:[#allocation6 + $0x48] sm:$0xff]  ;;  %1903 = vmatprep.subr.bf16.mxu1 %v1902_v3  ;;  %v154_v12 = vld [vmem:[#allocation6 + $0x58] sm:$0xff]  ;;  %v1908_v13 = vpack.c.bf16 %v149_v10, %v147_v9  ;;  %v151_v15 = vld [vmem:[#allocation6 + $0x40] sm:$0xff]  ;;  %s2576_s28 = scalar_lea.vmem %s1832_s27, 128  ;;  %p2581_p5 = scmp.lt.s32.totalorder %s1832_s27, %s1832_s27 }
  0x4f   :  { %1905 = vmatpush1.bf16.msra.mxu1 %v1904_v7  ;;  %v1910_v14 = vpack.c.bf16 %v154_v12, %v152_v11  ;;  %v153_v16 = vld [vmem:[#allocation6 + $0x50] sm:$0xff]  ;;  %v156_v17 = vld [vmem:[#allocation6 + $0x68] sm:$0xff]  ;;  %v158_v18 = vld [vmem:[#allocation6 + $0x78] sm:$0xff]  ;;  %p2577_p4 = scmp.ne.s32.totalorder %s1832_s27, %s2576_s28  ;;  %p2582_p6 = scmp.lt.s32.totalorder %s2576_s28, %s2576_s28 }
  0x50   :  { %1907 = vmatprep.subr.bf16.mxu1 %v1906_v8  ;;  %v1912_v19 = vpack.c.bf16 %v153_v16, %v151_v15  ;;  %v1914_v20 = vpack.c.bf16 %v158_v18, %v156_v17  ;;  %v155_v21 = vld [vmem:[#allocation6 + $0x60] sm:$0xff]  ;;  %v157_v22 = vld [vmem:[#allocation6 + $0x70] sm:$0xff]  ;;  %v160_v23 = vld [vmem:[#allocation6 + $0x88] sm:$0xff] }
  0x51   :  { %v162_v24 = vld [vmem:[#allocation6 + $0x98] sm:$0xff]  ;;  %v1916_v25 = vpack.c.bf16 %v157_v22, %v155_v21  ;;  %v159_v27 = vld [vmem:[#allocation6 + $0x80] sm:$0xff]  ;;  %v161_v28 = vld [vmem:[#allocation6 + $0x90] sm:$0xff]  ;;  %p2583_p7 = por %p2582_p6, %p2581_p5 }
  0x52   :  { %v1918_v26 = vpack.c.bf16 %v162_v24, %v160_v23  ;;  %v164_v29 = vld [vmem:[#allocation6 + $0xa8] sm:$0xff]  ;;  %v166_v30 = vld [vmem:[#allocation6 + $0xb8] sm:$0xff]  ;;  %v1920_v31 = vpack.c.bf16 %v161_v28, %v159_v27  ;;  %v163_v33 = vld [vmem:[#allocation6 + $0xa0] sm:$0xff] }
  0x53   :  { %1909 = vmatpush1.bf16.msra.mxu1 %v1908_v13  ;;  %v1922_v32 = vpack.c.bf16 %v166_v30, %v164_v29  ;;  %v165_v34 = vld [vmem:[#allocation6 + $0xb0] sm:$0xff]  ;;  %v168_v35 = vld [vmem:[#allocation6 + $0xc8] sm:$0xff]  ;;  %v170_v36 = vld [vmem:[#allocation6 + $0xd8] sm:$0xff]  ;;  %p2584_p8 = pnand %p2583_p7, %p2577_p4 }
  0x54   :  { %1911 = vmatprep.subr.bf16.mxu1 %v1910_v14  ;;  %v1924_v37 = vpack.c.bf16 %v165_v34, %v163_v33  ;;  %v1926_v38 = vpack.c.bf16 %v170_v36, %v168_v35  ;;  %v167_v39 = vld [vmem:[#allocation6 + $0xc0] sm:$0xff]  ;;  %v169_v40 = vld [vmem:[#allocation6 + $0xd0] sm:$0xff]  ;;  %v80_v41 = vld [vmem:[#allocation3 + $0x8] sm:$0xff] }
  0x55   :  { %v172_v42 = vld [vmem:[#allocation6 + $0xe8] sm:$0xff]  ;;  %v174_v43 = vld [vmem:[#allocation6 + $0xf8] sm:$0xff]  ;;  %475 = vmatprep.mubr.f32.mxu1 %v80_v41  ;;  %v1928_v46 = vpack.c.bf16 %v169_v40, %v167_v39  ;;  %v171_v47 = vld [vmem:[#allocation6 + $0xe0] sm:$0xff] }
  0x56   :  { %v336_v44 = vld [vmem:[#allocation6 + $0x608] sm:$0xff]  ;;  %v338_v45 = vld [vmem:[#allocation6 + $0x618] sm:$0xff]  ;;  %v335_v49 = vld [vmem:[#allocation6 + $0x600] sm:$0xff]  ;;  %v1930_v51 = vpack.c.bf16 %v174_v43, %v172_v42 }
  0x57   :  { %1913 = vmatpush1.bf16.msra.mxu1 %v1912_v19  ;;  %v2094_v48 = vpack.c.bf16 %v338_v45, %v336_v44  ;;  %v337_v50 = vld [vmem:[#allocation6 + $0x610] sm:$0xff]  ;;  %v176_v53 = vld [vmem:[#allocation6 + $0x108] sm:$0xff]  ;;  %v178_v54 = vld [vmem:[#allocation6 + $0x118] sm:$0xff] }
  0x58   :  { %1915 = vmatprep.subr.bf16.mxu1 %v1914_v20  ;;  %v173_v52 = vld [vmem:[#allocation6 + $0xf0] sm:$0xff]  ;;  %v2096_v55 = vpack.c.bf16 %v337_v50, %v335_v49  ;;  %v340_v56 = vld [vmem:[#allocation6 + $0x628] sm:$0xff]  ;;  %v342_v57 = vld [vmem:[#allocation6 + $0x638] sm:$0xff]  ;;  %v1934_v2 = vpack.c.bf16 %v178_v54, %v176_v53 }
  0x59   :  { %2095 = vmatprep.subr.bf16.mxu0 %v2094_v48  ;;  %v339_v58 = vld [vmem:[#allocation6 + $0x620] sm:$0xff]  ;;  %v2098_v59 = vpack.c.bf16 %v342_v57, %v340_v56  ;;  %v341_v60 = vld [vmem:[#allocation6 + $0x630] sm:$0xff]  ;;  %v1932_v61 = vpack.c.bf16 %v173_v52, %v171_v47  ;;  %v344_v1 = vld [vmem:[#allocation6 + $0x648] sm:$0xff] }
  0x5a   :  { %2097 = vmatpush1.bf16.msra.mxu0 %v2096_v55  ;;  %v175_v62 = vld [vmem:[#allocation6 + $0x100] sm:$0xff]  ;;  %v177_v63 = vld [vmem:[#allocation6 + $0x110] sm:$0xff]  ;;  %v2100_v0 = vpack.c.bf16 %v341_v60, %v339_v58  ;;  %v346_v3 = vld [vmem:[#allocation6 + $0x658] sm:$0xff] }
  0x5b   :  { %1917 = vmatpush1.bf16.msra.mxu1 %v1916_v25  ;;  %2099 = vmatprep.subr.bf16.mxu0 %v2098_v59  ;;  %v343_v4 = vld [vmem:[#allocation6 + $0x640] sm:$0xff]  ;;  %v345_v5 = vld [vmem:[#allocation6 + $0x650] sm:$0xff]  ;;  %v180_v6 = vld [vmem:[#allocation6 + $0x128] sm:$0xff]  ;;  %v2102_v8 = vpack.c.bf16 %v346_v3, %v344_v1  ;;  %v1936_v12 = vpack.c.bf16 %v177_v63, %v175_v62 }
  0x5c   :  { %1919 = vmatprep.subr.bf16.mxu1 %v1918_v26  ;;  %v182_v7 = vld [vmem:[#allocation6 + $0x138] sm:$0xff]  ;;  %v2104_v9 = vpack.c.bf16 %v345_v5, %v343_v4  ;;  %v348_v10 = vld [vmem:[#allocation6 + $0x668] sm:$0xff]  ;;  %v347_v14 = vld [vmem:[#allocation6 + $0x660] sm:$0xff] }
  0x5d   :  { %v350_v11 = vld [vmem:[#allocation6 + $0x678] sm:$0xff]  ;;  %v349_v15 = vld [vmem:[#allocation6 + $0x670] sm:$0xff]  ;;  %v1938_v16 = vpack.c.bf16 %v182_v7, %v180_v6  ;;  %v179_v17 = vld [vmem:[#allocation6 + $0x120] sm:$0xff] }
  0x5e   :  { %2101 = vmatpush1.bf16.msra.mxu0 %v2100_v0  ;;  %v2106_v13 = vpack.c.bf16 %v350_v11, %v348_v10  ;;  %v181_v18 = vld [vmem:[#allocation6 + $0x130] sm:$0xff]  ;;  %v184_v19 = vld [vmem:[#allocation6 + $0x148] sm:$0xff]  ;;  %v186_v20 = vld [vmem:[#allocation6 + $0x158] sm:$0xff]  ;;  %v2108_v23 = vpack.c.bf16 %v349_v15, %v347_v14 }
  0x5f   :  { %1921 = vmatpush1.bf16.msra.mxu1 %v1920_v31  ;;  %2103 = vmatprep.subr.bf16.mxu0 %v2102_v8  ;;  %v352_v21 = vld [vmem:[#allocation6 + $0x688] sm:$0xff]  ;;  %v354_v22 = vld [vmem:[#allocation6 + $0x698] sm:$0xff]  ;;  %v1940_v24 = vpack.c.bf16 %v181_v18, %v179_v17  ;;  %v183_v25 = vld [vmem:[#allocation6 + $0x140] sm:$0xff]  ;;  %v1942_v29 = vpack.c.bf16 %v186_v20, %v184_v19 }
  0x60   :  { %1923 = vmatprep.subr.bf16.mxu1 %v1922_v32  ;;  %v2110_v26 = vpack.c.bf16 %v354_v22, %v352_v21  ;;  %v351_v27 = vld [vmem:[#allocation6 + $0x680] sm:$0xff]  ;;  %v353_v28 = vld [vmem:[#allocation6 + $0x690] sm:$0xff]  ;;  %v356_v31 = vld [vmem:[#allocation6 + $0x6a8] sm:$0xff] }
  0x61   :  { %v185_v30 = vld [vmem:[#allocation6 + $0x150] sm:$0xff]  ;;  %v358_v32 = vld [vmem:[#allocation6 + $0x6b8] sm:$0xff]  ;;  %v188_v33 = vld [vmem:[#allocation6 + $0x168] sm:$0xff]  ;;  %v2112_v35 = vpack.c.bf16 %v353_v28, %v351_v27 }
  0x62   :  { %2105 = vmatpush1.bf16.msra.mxu0 %v2104_v9  ;;  %v190_v34 = vld [vmem:[#allocation6 + $0x178] sm:$0xff]  ;;  %v1944_v36 = vpack.c.bf16 %v185_v30, %v183_v25  ;;  %v355_v39 = vld [vmem:[#allocation6 + $0x6a0] sm:$0xff]  ;;  %v357_v40 = vld [vmem:[#allocation6 + $0x6b0] sm:$0xff] }
  0x63   :  { %1925 = vmatpush1.bf16.msra.mxu1 %v1924_v37  ;;  %2107 = vmatprep.subr.bf16.mxu0 %v2106_v13  ;;  %v187_v37 = vld [vmem:[#allocation6 + $0x160] sm:$0xff]  ;;  %v1946_v41 = vpack.c.bf16 %v190_v34, %v188_v33  ;;  %v189_v42 = vld [vmem:[#allocation6 + $0x170] sm:$0xff]  ;;  %v360_v43 = vld [vmem:[#allocation6 + $0x6c8] sm:$0xff]  ;;  %v2116_v47 = vpack.c.bf16 %v357_v40, %v355_v39 }
  0x64   :  { %1927 = vmatprep.subr.bf16.mxu1 %v1926_v38  ;;  %v2114_v38 = vpack.c.bf16 %v358_v32, %v356_v31  ;;  %v362_v44 = vld [vmem:[#allocation6 + $0x6d8] sm:$0xff]  ;;  %v192_v45 = vld [vmem:[#allocation6 + $0x188] sm:$0xff]  ;;  %v1948_v48 = vpack.c.bf16 %v189_v42, %v187_v37  ;;  %v191_v49 = vld [vmem:[#allocation6 + $0x180] sm:$0xff] }
  0x65   :  { %v2118_v50 = vpack.c.bf16 %v362_v44, %v360_v43  ;;  %v361_v52 = vld [vmem:[#allocation6 + $0x6d0] sm:$0xff]  ;;  %v364_v55 = vld [vmem:[#allocation6 + $0x6e8] sm:$0xff]  ;;  %v366_v56 = vld [vmem:[#allocation6 + $0x6f8] sm:$0xff] }
  0x66   :  { %2109 = vmatpush1.bf16.msra.mxu0 %v2108_v23  ;;  %v193_v54 = vld [vmem:[#allocation6 + $0x190] sm:$0xff]  ;;  %v196_v57 = vld [vmem:[#allocation6 + $0x1a8] sm:$0xff]  ;;  %v198_v58 = vld [vmem:[#allocation6 + $0x1b8] sm:$0xff]  ;;  %v2122_v62 = vpack.c.bf16 %v366_v56, %v364_v55 }
  0x67   :  { %1929 = vmatpush1.bf16.msra.mxu1 %v1928_v46  ;;  %2111 = vmatprep.subr.bf16.mxu0 %v2110_v26  ;;  %v194_v46 = vld [vmem:[#allocation6 + $0x198] sm:$0xff]  ;;  %v1952_v60 = vpack.c.bf16 %v193_v54, %v191_v49  ;;  %v363_v63 = vld [vmem:[#allocation6 + $0x6e0] sm:$0xff]  ;;  %v365_v0 = vld [vmem:[#allocation6 + $0x6f0] sm:$0xff]  ;;  %v1954_v1 = vpack.c.bf16 %v198_v58, %v196_v57 }
  0x68   :  { %1931 = vmatprep.subr.bf16.mxu1 %v1930_v51  ;;  %v359_v51 = vld [vmem:[#allocation6 + $0x6c0] sm:$0xff]  ;;  %v1950_v53 = vpack.c.bf16 %v194_v46, %v192_v45  ;;  %v368_v3 = vld [vmem:[#allocation6 + $0x708] sm:$0xff]  ;;  %v370_v4 = vld [vmem:[#allocation6 + $0x718] sm:$0xff]  ;;  %v2124_v7 = vpack.c.bf16 %v365_v0, %v363_v63 }
  0x69   :  { %v2120_v59 = vpack.c.bf16 %v361_v52, %v359_v51  ;;  %v200_v5 = vld [vmem:[#allocation6 + $0x1c8] sm:$0xff]  ;;  %v202_v6 = vld [vmem:[#allocation6 + $0x1d8] sm:$0xff]  ;;  %v199_v9 = vld [vmem:[#allocation6 + $0x1c0] sm:$0xff]  ;;  %v2126_v10 = vpack.c.bf16 %v370_v4, %v368_v3 }
  0x6a   :  { %2113 = vmatpush1.bf16.msra.mxu0 %v2112_v35  ;;  %v367_v11 = vld [vmem:[#allocation6 + $0x700] sm:$0xff]  ;;  %v1958_v13 = vpack.c.bf16 %v202_v6, %v200_v5  ;;  %v201_v14 = vld [vmem:[#allocation6 + $0x1d0] sm:$0xff]  ;;  %v372_v15 = vld [vmem:[#allocation6 + $0x728] sm:$0xff] }
  0x6b   :  { %1933 = vmatpush1.bf16.msra.mxu1 %v1932_v61  ;;  %2115 = vmatprep.subr.bf16.mxu0 %v2114_v38  ;;  %v195_v61 = vld [vmem:[#allocation6 + $0x1a0] sm:$0xff]  ;;  %v204_v17 = vld [vmem:[#allocation6 + $0x1e8] sm:$0xff]  ;;  %v206_v18 = vld [vmem:[#allocation6 + $0x1f8] sm:$0xff]  ;;  %v1960_v20 = vpack.c.bf16 %v201_v14, %v199_v9 }
  0x6c   :  { %1935 = vmatprep.subr.bf16.mxu1 %v1934_v2  ;;  %v197_v2 = vld [vmem:[#allocation6 + $0x1b0] sm:$0xff]  ;;  %v203_v21 = vld [vmem:[#allocation6 + $0x1e0] sm:$0xff]  ;;  %v1962_v25 = vpack.c.bf16 %v206_v18, %v204_v17  ;;  %v376_v27 = vld [vmem:[#allocation6 + $0x748] sm:$0xff] }
  0x6d   :  { %v1956_v8 = vpack.c.bf16 %v197_v2, %v195_v61  ;;  %v371_v23 = vld [vmem:[#allocation6 + $0x720] sm:$0xff]  ;;  %v205_v26 = vld [vmem:[#allocation6 + $0x1f0] sm:$0xff]  ;;  %v378_v28 = vld [vmem:[#allocation6 + $0x758] sm:$0xff] }
  0x6e   :  { %2117 = vmatpush1.bf16.msra.mxu0 %v2116_v47  ;;  %v210_v30 = vld [vmem:[#allocation6 + $0x218] sm:$0xff]  ;;  %v1964_v32 = vpack.c.bf16 %v205_v26, %v203_v21  ;;  %v2134_v33 = vpack.c.bf16 %v378_v28, %v376_v27  ;;  %v375_v34 = vld [vmem:[#allocation6 + $0x740] sm:$0xff]  ;;  %v377_v35 = vld [vmem:[#allocation6 + $0x750] sm:$0xff] }
  0x6f   :  { %1937 = vmatpush1.bf16.msra.mxu1 %v1936_v12  ;;  %2119 = vmatprep.subr.bf16.mxu0 %v2118_v50  ;;  %v369_v12 = vld [vmem:[#allocation6 + $0x710] sm:$0xff]  ;;  %v207_v37 = vld [vmem:[#allocation6 + $0x200] sm:$0xff]  ;;  %v212_v39 = vld [vmem:[#allocation6 + $0x228] sm:$0xff]  ;;  %v2136_v44 = vpack.c.bf16 %v377_v35, %v375_v34 }
  0x70   :  { %1939 = vmatprep.subr.bf16.mxu1 %v1938_v16  ;;  %v374_v16 = vld [vmem:[#allocation6 + $0x738] sm:$0xff]  ;;  %v2128_v19 = vpack.c.bf16 %v369_v12, %v367_v11  ;;  %v209_v38 = vld [vmem:[#allocation6 + $0x210] sm:$0xff]  ;;  %v79_v43 = vld [vmem:[#allocation3] sm:$0xff] }
  0x71   :  { %v2130_v22 = vpack.c.bf16 %v374_v16, %v372_v15  ;;  %v214_v40 = vld [vmem:[#allocation6 + $0x238] sm:$0xff]  ;;  %v1968_v45 = vpack.c.bf16 %v209_v38, %v207_v37  ;;  %v211_v46 = vld [vmem:[#allocation6 + $0x220] sm:$0xff]  ;;  %v213_v50 = vld [vmem:[#allocation6 + $0x230] sm:$0xff] }
  0x72   :  { %2121 = vmatpush1.bf16.msra.mxu0 %v2120_v59  ;;  %v382_v42 = vld [vmem:[#allocation6 + $0x778] sm:$0xff]  ;;  %v379_v47 = vld [vmem:[#allocation6 + $0x760] sm:$0xff]  ;;  %v1970_v49 = vpack.c.bf16 %v214_v40, %v212_v39  ;;  %v216_v51 = vld [vmem:[#allocation6 + $0x248] sm:$0xff]  ;;  %v1972_v59 = vpack.c.bf16 %v213_v50, %v211_v46 }
  0x73   :  { %1941 = vmatpush1.bf16.msra.mxu1 %v1940_v24  ;;  %2123 = vmatprep.subr.bf16.mxu0 %v2122_v62  ;;  %v373_v24 = vld [vmem:[#allocation6 + $0x730] sm:$0xff]  ;;  %v88_v52 = vld [vmem:[#allocation3 + $0x48] sm:$0xff]  ;;  %v218_v54 = vld [vmem:[#allocation6 + $0x258] sm:$0xff] }
  0x74   :  { %1943 = vmatprep.subr.bf16.mxu1 %v1942_v29  ;;  %v208_v29 = vld [vmem:[#allocation6 + $0x208] sm:$0xff]  ;;  %v2132_v31 = vpack.c.bf16 %v373_v24, %v371_v23  ;;  %v386_v56 = vld [vmem:[#allocation6 + $0x798] sm:$0xff]  ;;  %v215_v57 = vld [vmem:[#allocation6 + $0x240] sm:$0xff]  ;;  %v1974_v63 = vpack.c.bf16 %v218_v54, %v216_v51 }
  0x75   :  { %v384_v55 = vld [vmem:[#allocation6 + $0x788] sm:$0xff]  ;;  %v383_v61 = vld [vmem:[#allocation6 + $0x780] sm:$0xff]  ;;  %v385_v62 = vld [vmem:[#allocation6 + $0x790] sm:$0xff] }
  0x76   :  { %2125 = vmatpush1.bf16.msra.mxu0 %v2124_v7  ;;  %v217_v0 = vld [vmem:[#allocation6 + $0x250] sm:$0xff]  ;;  %v96_v2 = vld [vmem:[#allocation3 + $0x88] sm:$0xff]  ;;  %v2142_v3 = vpack.c.bf16 %v386_v56, %v384_v55  ;;  %v222_v4 = vld [vmem:[#allocation6 + $0x278] sm:$0xff] }
  0x77   :  { %1945 = vmatpush1.bf16.msra.mxu1 %v1944_v36  ;;  %2127 = vmatprep.subr.bf16.mxu0 %v2126_v10  ;;  %v1966_v36 = vpack.c.bf16 %v210_v30, %v208_v29  ;;  %v388_v5 = vld [vmem:[#allocation6 + $0x7a8] sm:$0xff]  ;;  %v390_v6 = vld [vmem:[#allocation6 + $0x7b8] sm:$0xff]  ;;  %v219_v7 = vld [vmem:[#allocation6 + $0x260] sm:$0xff]  ;;  %v1976_v10 = vpack.c.bf16 %v217_v0, %v215_v57 }
  0x78   :  { %1947 = vmatprep.subr.bf16.mxu1 %v1946_v41  ;;  %v380_v41 = vld [vmem:[#allocation6 + $0x768] sm:$0xff]  ;;  %v86_v9 = vld [vmem:[#allocation3 + $0x38] sm:$0xff]  ;;  %v95_v11 = vld [vmem:[#allocation3 + $0x80] sm:$0xff]  ;;  %v2146_v18 = vpack.c.bf16 %v390_v6, %v388_v5 }
  0x79   :  { %v387_v12 = vld [vmem:[#allocation6 + $0x7a0] sm:$0xff]  ;;  %v221_v15 = vld [vmem:[#allocation6 + $0x270] sm:$0xff]  ;;  %v224_v16 = vld [vmem:[#allocation6 + $0x288] sm:$0xff]  ;;  %814 = vmatprep.mubr.f32.mxu0 %v86_v9 }
  0x7a   :  { %2129 = vmatpush1.bf16.msra.mxu0 %v2128_v19  ;;  %v104_v17 = vld [vmem:[#allocation3 + $0xc8] sm:$0xff]  ;;  %v226_v19 = vld [vmem:[#allocation6 + $0x298] sm:$0xff]  ;;  %v1980_v24 = vpack.c.bf16 %v221_v15, %v219_v7  ;;  %v391_v26 = vld [vmem:[#allocation6 + $0x7c0] sm:$0xff] }
  0x7b   :  { %1949 = vmatpush1.bf16.msra.mxu1 %v1948_v48  ;;  %2131 = vmatprep.subr.bf16.mxu0 %v2130_v22  ;;  %v381_v48 = vld [vmem:[#allocation6 + $0x770] sm:$0xff]  ;;  %v394_v21 = vld [vmem:[#allocation6 + $0x7d8] sm:$0xff]  ;;  %v223_v22 = vld [vmem:[#allocation6 + $0x280] sm:$0xff]  ;;  %v1982_v28 = vpack.c.bf16 %v226_v19, %v224_v16 }
  0x7c   :  { %1951 = vmatprep.subr.bf16.mxu1 %v1950_v53  ;;  %v2138_v53 = vpack.c.bf16 %v382_v42, %v380_v41  ;;  %v2140_v58 = vpack.c.bf16 %v381_v48, %v379_v47  ;;  %v393_v27 = vld [vmem:[#allocation6 + $0x7d0] sm:$0xff]  ;;  %v228_v30 = vld [vmem:[#allocation6 + $0x2a8] sm:$0xff]  ;;  %v398_v35 = vld [vmem:[#allocation6 + $0x7f8] sm:$0xff] }
  0x7d   :  { %v225_v29 = vld [vmem:[#allocation6 + $0x290] sm:$0xff]  ;;  %v396_v34 = vld [vmem:[#allocation6 + $0x7e8] sm:$0xff]  ;;  %v2152_v37 = vpack.c.bf16 %v393_v27, %v391_v26  ;;  %v111_v39 = vld [vmem:[#allocation3 + $0x100] sm:$0xff] }
  0x7e   :  { %2133 = vmatpush1.bf16.msra.mxu0 %v2132_v31  ;;  %v112_v31 = vld [vmem:[#allocation3 + $0x108] sm:$0xff]  ;;  %v1984_v38 = vpack.c.bf16 %v225_v29, %v223_v22  ;;  %v395_v40 = vld [vmem:[#allocation6 + $0x7e0] sm:$0xff]  ;;  %v397_v41 = vld [vmem:[#allocation6 + $0x7f0] sm:$0xff]  ;;  %v2154_v46 = vpack.c.bf16 %v398_v35, %v396_v34 }
  0x7f   :  { %1953 = vmatpush1.bf16.msra.mxu1 %v1952_v60  ;;  %2135 = vmatprep.subr.bf16.mxu0 %v2134_v33  ;;  %v87_v60 = vld [vmem:[#allocation3 + $0x40] sm:$0xff]  ;;  %v230_v33 = vld [vmem:[#allocation6 + $0x2b8] sm:$0xff]  ;;  %v885_v48 = vld [vmem:[#allocation8 + $0x8] sm:$0xff]  ;;  %v2156_v50 = vpack.c.bf16 %v397_v41, %v395_v40 }
  0x80   :  { %1955 = vmatprep.subr.bf16.mxu1 %v1954_v1  ;;  %v220_v1 = vld [vmem:[#allocation6 + $0x268] sm:$0xff]  ;;  %v1986_v42 = vpack.c.bf16 %v230_v33, %v228_v30  ;;  %v234_v47 = vld [vmem:[#allocation6 + $0x2d8] sm:$0xff]  ;;  %v233_v55 = vld [vmem:[#allocation6 + $0x2d0] sm:$0xff] }
  0x81   :  { %v1978_v14 = vpack.c.bf16 %v222_v4, %v220_v1  ;;  %v236_v56 = vld [vmem:[#allocation6 + $0x2e8] sm:$0xff]  ;;  %v891_v0 = vld [vmem:[#allocation8 + $0x38] sm:$0xff]  ;;  %v237_v6 = vld [vmem:[#allocation6 + $0x2f0] sm:$0xff] }
  0x82   :  { %2137 = vmatpush1.bf16.msra.mxu0 %v2136_v44  ;;  %v232_v44 = vld [vmem:[#allocation6 + $0x2c8] sm:$0xff]  ;;  %v94_v4 = vld [vmem:[#allocation3 + $0x78] sm:$0xff]  ;;  %v135_v19 = vld [vmem:[#allocation3 + $0x1c0] sm:$0xff] }
  0x83   :  { %1957 = vmatpush1.bf16.msra.mxu1 %v1956_v8  ;;  %2139 = vmatprep.subr.bf16.mxu0 %v2138_v53  ;;  %v2144_v8 = vpack.c.bf16 %v385_v62, %v383_v61  ;;  %v119_v53 = vld [vmem:[#allocation3 + $0x140] sm:$0xff]  ;;  %v1990_v54 = vpack.c.bf16 %v234_v47, %v232_v44  ;;  %v128_v57 = vld [vmem:[#allocation3 + $0x188] sm:$0xff]  ;;  %v886_v61 = vld [vmem:[#allocation8 + $0x10] sm:$0xff] }
  0x84   :  { %1959 = vmatprep.subr.bf16.mxu1 %v1958_v13  ;;  %v389_v13 = vld [vmem:[#allocation6 + $0x7b0] sm:$0xff]  ;;  %v240_v7 = vld [vmem:[#allocation6 + $0x308] sm:$0xff]  ;;  %v895_v16 = vld [vmem:[#allocation8 + $0x58] sm:$0xff] }
  0x85   :  { %v2148_v23 = vpack.c.bf16 %v389_v13, %v387_v12  ;;  %v85_v62 = vld [vmem:[#allocation3 + $0x30] sm:$0xff]  ;;  %v888_v12 = vld [vmem:[#allocation8 + $0x20] sm:$0xff]  ;;  %v893_v15 = vld [vmem:[#allocation8 + $0x48] sm:$0xff] }
  0x86   :  { %2141 = vmatpush1.bf16.msra.mxu0 %v2140_v58  ;;  %v890_v13 = vld [vmem:[#allocation8 + $0x30] sm:$0xff]  ;;  %v246_v26 = vld [vmem:[#allocation6 + $0x338] sm:$0xff]  ;;  %v2728_v27 = vpack.c.bf16 %v895_v16, %v893_v15 }
  0x87   :  { %1961 = vmatpush1.bf16.msra.mxu1 %v1960_v20  ;;  %2143 = vmatprep.subr.bf16.mxu0 %v2142_v3  ;;  %v392_v20 = vld [vmem:[#allocation6 + $0x7c8] sm:$0xff]  ;;  %v127_v3 = vld [vmem:[#allocation3 + $0x180] sm:$0xff]  ;;  %v241_v22 = vld [vmem:[#allocation6 + $0x310] sm:$0xff] }
  0x88   :  { %1963 = vmatprep.subr.bf16.mxu1 %v1962_v25  ;;  %v103_v25 = vld [vmem:[#allocation3 + $0xc0] sm:$0xff]  ;;  %v894_v29 = vld [vmem:[#allocation8 + $0x50] sm:$0xff]  ;;  %v110_v34 = vld [vmem:[#allocation3 + $0xf8] sm:$0xff] }
  0x89   :  { %v101_v30 = vld [vmem:[#allocation3 + $0xb0] sm:$0xff]  ;;  %v250_v40 = vld [vmem:[#allocation6 + $0x358] sm:$0xff] }
  0x8a   :  { %2145 = vmatpush1.bf16.msra.mxu0 %v2144_v8  ;;  %v136_v8 = vld [vmem:[#allocation3 + $0x1c8] sm:$0xff]  ;;  %v109_v44 = vld [vmem:[#allocation3 + $0xf0] sm:$0xff]  ;;  %v266_v15 = vld [vmem:[#allocation6 + $0x3d8] sm:$0xff] }
  0x8b   :  { %1965 = vmatpush1.bf16.msra.mxu1 %v1964_v32  ;;  %2147 = vmatprep.subr.bf16.mxu0 %v2146_v18  ;;  %v2150_v32 = vpack.c.bf16 %v394_v21, %v392_v20  ;;  %v239_v18 = vld [vmem:[#allocation6 + $0x300] sm:$0xff]  ;;  %v102_v20 = vld [vmem:[#allocation3 + $0xb8] sm:$0xff]  ;;  %v141_v16 = vld [vmem:[#allocation3 + $0x1f0] sm:$0xff] }
  0x8c   :  { %1967 = vmatprep.subr.bf16.mxu1 %v1966_v36  ;;  %v227_v36 = vld [vmem:[#allocation6 + $0x2a0] sm:$0xff]  ;;  %v2000_v33 = vpack.c.bf16 %v241_v22, %v239_v18  ;;  %v270_v22 = vld [vmem:[#allocation6 + $0x3f8] sm:$0xff] }
  0x8e   :  { %476 = vmatmul.mubr.f32.vlgmr.msra.gmra.mrb[0].mxu1 %v79_v43  ;;  %2149 = vmatpush1.bf16.msra.mxu0 %v2148_v23  ;;  %v229_v43 = vld [vmem:[#allocation6 + $0x2b0] sm:$0xff]  ;;  %v244_v23 = vld [vmem:[#allocation6 + $0x328] sm:$0xff] }
  0x8f   :  { %1969 = vmatpush1.bf16.msra.mxu1 %v1968_v45  ;;  %481 = vmatprep.mubr.f32.mxu1 %v88_v52  ;;  %v120_v45 = vld [vmem:[#allocation3 + $0x148] sm:$0xff]  ;;  %v1988_v51 = vpack.c.bf16 %v229_v43, %v227_v36  ;;  %v231_v52 = vld [vmem:[#allocation6 + $0x2c0] sm:$0xff]  ;;  %v2002_v35 = vpack.c.bf16 %v246_v26, %v244_v23  ;;  %v898_v43 = vld [vmem:[#allocation8 + $0x70] sm:$0xff]  ;;  %v2616_v23 = vmov 0.0  }
  0x90   :  { %1971 = vmatprep.subr.bf16.mxu1 %v1970_v49  ;;  %2151 = vmatprep.subr.bf16.mxu0 %v2150_v32  ;;  %v887_v49 = vld [vmem:[#allocation8 + $0x18] sm:$0xff]  ;;  %v1992_v1 = vpack.c.bf16 %v233_v55, %v231_v52  ;;  %v243_v36 = vld [vmem:[#allocation6 + $0x320] sm:$0xff] }
  0x91   :  { %v2717_v58 = vpack.c.bf16 %v887_v49, %v885_v48  ;;  %v899_v32 = vld [vmem:[#allocation8 + $0x78] sm:$0xff]  ;;  %v247_v48 = vld [vmem:[#allocation6 + $0x340] sm:$0xff]  ;;  %v249_v49 = vld [vmem:[#allocation6 + $0x350] sm:$0xff] }
  0x92   :  { %482 = vmatmul.mubr.f32.gmra.mrb[2].mxu1 %v87_v60  ;;  %2153 = vmatpush1.bf16.msra.mxu0 %v2152_v37  ;;  %v884_v60 = vld [vmem:[#allocation8] sm:$0xff]  ;;  %v245_v37 = vld [vmem:[#allocation6 + $0x330] sm:$0xff]  ;;  %v254_v52 = vld [vmem:[#allocation6 + $0x378] sm:$0xff] }
  0x93   :  { %1973 = vmatpush1.bf16.msra.mxu1 %v1972_v59  ;;  %487 = vmatprep.mubr.f32.mxu1 %v96_v2  ;;  %v238_v59 = vld [vmem:[#allocation6 + $0x2f8] sm:$0xff]  ;;  %v235_v2 = vld [vmem:[#allocation6 + $0x2e0] sm:$0xff]  ;;  %v2720_v9 = vpack.c.bf16 %v886_v61, %v884_v60  ;;  %v256_v60 = vld [vmem:[#allocation6 + $0x388] sm:$0xff] }
  0x94   :  { %1975 = vmatprep.subr.bf16.mxu1 %v1974_v63  ;;  %2155 = vmatprep.subr.bf16.mxu0 %v2154_v46  ;;  %v889_v63 = vld [vmem:[#allocation8 + $0x28] sm:$0xff]  ;;  %v1994_v5 = vpack.c.bf16 %v238_v59, %v236_v56  ;;  %v118_v46 = vld [vmem:[#allocation3 + $0x138] sm:$0xff]  ;;  %v253_v59 = vld [vmem:[#allocation6 + $0x370] sm:$0xff] }
  0x95   :  { %v126_v55 = vld [vmem:[#allocation3 + $0x178] sm:$0xff] }
  0x96   :  { %488 = vmatmul.mubr.f32.gmra.mrb[4].mxu1 %v95_v11  ;;  %2157 = vmatpush1.bf16.msra.mxu0 %v2156_v50  ;;  %v2722_v11 = vpack.c.bf16 %v891_v0, %v889_v63  ;;  %v258_v61 = vld [vmem:[#allocation6 + $0x398] sm:$0xff] }
  0x97   :  { %1977 = vmatpush1.bf16.msra.mxu1 %v1976_v10  ;;  %493 = vmatprep.mubr.f32.mxu1 %v104_v17  ;;  %v242_v10 = vld [vmem:[#allocation6 + $0x318] sm:$0xff]  ;;  %v1996_v17 = vpack.c.bf16 %v237_v6, %v235_v2  ;;  %v255_v2 = vld [vmem:[#allocation6 + $0x380] sm:$0xff]  ;;  %v133_v6 = vld [vmem:[#allocation3 + $0x1b0] sm:$0xff] }
  0x98   :  { %1979 = vmatprep.subr.bf16.mxu1 %v1978_v14  ;;  %2159 = vmatprep.subr.bf16.mxu0 %v2717_v58  ;;  %v93_v14 = vld [vmem:[#allocation3 + $0x70] sm:$0xff]  ;;  %v1998_v21 = vpack.c.bf16 %v242_v10, %v240_v7  ;;  %v134_v0 = vld [vmem:[#allocation3 + $0x1b8] sm:$0xff] }
  0x99   :  { %815 = vmatmul.mubr.f32.vlgmr.msra.gmra.mrb[0].mxu0 %v85_v62  ;;  %v125_v62 = vld [vmem:[#allocation3 + $0x170] sm:$0xff] }
  0x9a   :  { %494 = vmatmul.mubr.f32.gmra.mrb[6].mxu1 %v103_v25  ;;  %820 = vmatprep.mubr.f32.mxu0 %v94_v4  ;;  %v2725_v25 = vpack.c.bf16 %v890_v13, %v888_v12  ;;  %v260_v4 = vld [vmem:[#allocation6 + $0x3a8] sm:$0xff]  ;;  %v259_v12 = vld [vmem:[#allocation6 + $0x3a0] sm:$0xff]  ;;  %v261_v13 = vld [vmem:[#allocation6 + $0x3b0] sm:$0xff] }
  0x9b   :  { %1981 = vmatpush1.bf16.msra.mxu1 %v1980_v24  ;;  %499 = vmatprep.mubr.f32.mxu1 %v112_v31  ;;  %v82_v24 = vld [vmem:[#allocation3 + $0x18] sm:$0xff]  ;;  %v897_v31 = vld [vmem:[#allocation8 + $0x68] sm:$0xff] }
  0x9c   :  { %1983 = vmatprep.subr.bf16.mxu1 %v1982_v28  ;;  %2161 = vmatpush1.bf16.msra.mxu0 %v2720_v9  ;;  %v892_v28 = vld [vmem:[#allocation8 + $0x40] sm:$0xff]  ;;  %v2734_v41 = vpack.c.bf16 %v899_v32, %v897_v31  ;;  %v274_v31 = vld [vmem:[#allocation6 + $0x418] sm:$0xff] }
  0x9d   :  { %821 = vmatmul.mubr.f32.gmra.mrb[2].mxu0 %v93_v14  ;;  %2163 = vmatprep.subr.bf16.mxu0 %v2722_v11  ;;  %v264_v14 = vld [vmem:[#allocation6 + $0x3c8] sm:$0xff] }
  0x9e   :  { %500 = vmatmul.mubr.f32.gmra.mrb[8].mxu1 %v111_v39  ;;  %826 = vmatprep.mubr.f32.mxu0 %v102_v20  ;;  %v2731_v39 = vpack.c.bf16 %v894_v29, %v892_v28  ;;  %v2022_v18 = vpack.c.bf16 %v266_v15, %v264_v14  ;;  %v265_v20 = vld [vmem:[#allocation6 + $0x3d0] sm:$0xff]  ;;  %v267_v28 = vld [vmem:[#allocation6 + $0x3e0] sm:$0xff] }
  0x9f   :  { %1985 = vmatpush1.bf16.msra.mxu1 %v1984_v38  ;;  %505 = vmatprep.mubr.f32.mxu1 %v120_v45  ;;  %v248_v38 = vld [vmem:[#allocation6 + $0x348] sm:$0xff]  ;;  %v2004_v45 = vpack.c.bf16 %v245_v37, %v243_v36  ;;  %v269_v29 = vld [vmem:[#allocation6 + $0x3f0] sm:$0xff]  ;;  %v278_v37 = vld [vmem:[#allocation6 + $0x438] sm:$0xff] }
  0xa0   :  { %1987 = vmatprep.subr.bf16.mxu1 %v1986_v42  ;;  %2165 = vmatpush1.bf16.msra.mxu0 %v2725_v25  ;;  %v896_v42 = vld [vmem:[#allocation8 + $0x60] sm:$0xff]  ;;  %v2006_v47 = vpack.c.bf16 %v250_v40, %v248_v38  ;;  %v2028_v32 = vpack.c.bf16 %v269_v29, %v267_v28  ;;  %v276_v36 = vld [vmem:[#allocation6 + $0x428] sm:$0xff]  ;;  %v81_v38 = vld [vmem:[#allocation3 + $0x10] sm:$0xff] }
  0xa1   :  { %827 = vmatmul.mubr.f32.gmra.mrb[4].mxu0 %v101_v30  ;;  %2167 = vmatprep.subr.bf16.mxu0 %v2728_v27  ;;  %v2737_v50 = vpack.c.bf16 %v898_v43, %v896_v42  ;;  %v272_v30 = vld [vmem:[#allocation6 + $0x408] sm:$0xff]  ;;  %v2034_v42 = vpack.c.bf16 %v278_v37, %v276_v36  ;;  %v275_v43 = vld [vmem:[#allocation6 + $0x420] sm:$0xff]  ;;  %v130_v28 = vld [vmem:[#allocation3 + $0x198] sm:$0xff] }
  0xa2   :  { %506 = vmatmul.mubr.f32.gmra.mrb[10].mxu1 %v119_v53  ;;  %832 = vmatprep.mubr.f32.mxu0 %v110_v34  ;;  %v117_v53 = vld [vmem:[#allocation3 + $0x130] sm:$0xff]  ;;  %v271_v34 = vld [vmem:[#allocation6 + $0x400] sm:$0xff]  ;;  %v300_v29 = vld [vmem:[#allocation6 + $0x4e8] sm:$0xff] }
  0xa3   :  { %1989 = vmatpush1.bf16.msra.mxu1 %v1988_v51  ;;  %511 = vmatprep.mubr.f32.mxu1 %v128_v57  ;;  %v252_v51 = vld [vmem:[#allocation6 + $0x368] sm:$0xff]  ;;  %v251_v57 = vld [vmem:[#allocation6 + $0x360] sm:$0xff]  ;;  %v138_v36 = vld [vmem:[#allocation3 + $0x1d8] sm:$0xff] }
  0xa4   :  { %1991 = vmatprep.subr.bf16.mxu1 %v1990_v54  ;;  %2169 = vmatpush1.bf16.msra.mxu0 %v2731_v39  ;;  %v2008_v54 = vpack.c.bf16 %v249_v49, %v247_v48  ;;  %v2010_v56 = vpack.c.bf16 %v254_v52, %v252_v51  ;;  %v2012_v63 = vpack.c.bf16 %v253_v59, %v251_v57  ;;  %v89_v49 = vld [vmem:[#allocation3 + $0x50] sm:$0xff]  ;;  %v279_v52 = vld [vmem:[#allocation6 + $0x440] sm:$0xff]  ;;  %v304_v37 = vld [vmem:[#allocation6 + $0x508] sm:$0xff] }
  0xa5   :  { %833 = vmatmul.mubr.f32.gmra.mrb[6].mxu0 %v109_v44  ;;  %2171 = vmatprep.subr.bf16.mxu0 %v2734_v41  ;;  %v277_v44 = vld [vmem:[#allocation6 + $0x430] sm:$0xff]  ;;  %v291_v15 = vld [vmem:[#allocation6 + $0x4a0] sm:$0xff] }
  0xa6   :  { %512 = vmatmul.mubr.f32.gmra.mrb[12].mxu1 %v127_v3  ;;  %838 = vmatprep.mubr.f32.mxu0 %v118_v46  ;;  %v257_v3 = vld [vmem:[#allocation6 + $0x390] sm:$0xff]  ;;  %v280_v46 = vld [vmem:[#allocation6 + $0x448] sm:$0xff]  ;;  %v2036_v48 = vpack.c.bf16 %v277_v44, %v275_v43  ;;  %v303_v44 = vld [vmem:[#allocation6 + $0x500] sm:$0xff] }
  0xa7   :  { %1993 = vmatpush1.bf16.msra.mxu1 %v1992_v1  ;;  %517 = vmatprep.mubr.f32.mxu1 %v136_v8  ;;  %v2014_v1 = vpack.c.bf16 %v258_v61, %v256_v60  ;;  %v2016_v7 = vpack.c.bf16 %v257_v3, %v255_v2  ;;  %v142_v8 = vld [vmem:[#allocation3 + $0x1f8] sm:$0xff]  ;;  %v97_v59 = vld [vmem:[#allocation3 + $0x90] sm:$0xff]  ;;  %v283_v61 = vld [vmem:[#allocation6 + $0x460] sm:$0xff] }
  0xa8   :  { %1995 = vmatprep.subr.bf16.mxu1 %v1994_v5  ;;  %2173 = vmatpush1.bf16.msra.mxu0 %v2737_v50  ;;  %v262_v5 = vld [vmem:[#allocation6 + $0x3b8] sm:$0xff]  ;;  %v105_v3 = vld [vmem:[#allocation3 + $0xd0] sm:$0xff] }
  0xa9   :  { %839 = vmatmul.mubr.f32.gmra.mrb[8].mxu0 %v117_v53  ;;  %2175 = vmatprep.subr.bf16.mxu0 %v2717_v58  ;;  %v2018_v10 = vpack.c.bf16 %v262_v5, %v260_v4  ;;  %v281_v53 = vld [vmem:[#allocation6 + $0x450] sm:$0xff]  ;;  %v287_v5 = vld [vmem:[#allocation6 + $0x480] sm:$0xff] }
  0xaa   :  { %518 = vmatmul.mubr.f32.gmra.mrb[14].mxu1 %v135_v19  ;;  %844 = vmatprep.mubr.f32.mxu0 %v126_v55  ;;  %v263_v19 = vld [vmem:[#allocation6 + $0x3c0] sm:$0xff]  ;;  %v284_v55 = vld [vmem:[#allocation6 + $0x468] sm:$0xff]  ;;  %v2040_v57 = vpack.c.bf16 %v281_v53, %v279_v52  ;;  %v309_v53 = vld [vmem:[#allocation6 + $0x530] sm:$0xff] }
  0xab   :  { %1997 = vmatpush1.bf16.msra.mxu1 %v1996_v17  ;;  %588 = vmatprep.mubr.f32.mxu1 %v82_v24  ;;  %v2020_v17 = vpack.c.bf16 %v261_v13, %v259_v12  ;;  %v2024_v24 = vpack.c.bf16 %v265_v20, %v263_v19  ;;  %v113_v13 = vld [vmem:[#allocation3 + $0x110] sm:$0xff]  ;;  %v298_v19 = vld [vmem:[#allocation6 + $0x4d8] sm:$0xff]  ;;  %v307_v52 = vld [vmem:[#allocation6 + $0x520] sm:$0xff] }
  0xac   :  { %1999 = vmatprep.subr.bf16.mxu1 %v1998_v21  ;;  %v268_v21 = vld [vmem:[#allocation6 + $0x3e8] sm:$0xff] }
  0xad   :  { %845 = vmatmul.mubr.f32.gmra.mrb[10].mxu0 %v125_v62  ;;  %v2026_v26 = vpack.c.bf16 %v270_v22, %v268_v21  ;;  %v285_v62 = vld [vmem:[#allocation6 + $0x470] sm:$0xff] }
  0xae   :  { %850 = vmatprep.mubr.f32.mxu0 %v134_v0  ;;  %v288_v0 = vld [vmem:[#allocation6 + $0x488] sm:$0xff]  ;;  %v2044_v2 = vpack.c.bf16 %v285_v62, %v283_v61  ;;  %v121_v21 = vld [vmem:[#allocation3 + $0x150] sm:$0xff]  ;;  %v318_v62 = vld [vmem:[#allocation6 + $0x578] sm:$0xff] }
  0xaf   :  { %2001 = vmatpush1.bf16.msra.mxu1 %v2000_v33  ;;  %v2030_v33 = vpack.c.bf16 %v274_v31, %v272_v30  ;;  %v302_v30 = vld [vmem:[#allocation6 + $0x4f8] sm:$0xff]  ;;  %v316_v61 = vld [vmem:[#allocation6 + $0x568] sm:$0xff] }
  0xb0   :  { %2003 = vmatprep.subr.bf16.mxu1 %v2002_v35  ;;  %v273_v35 = vld [vmem:[#allocation6 + $0x410] sm:$0xff] }
  0xb1   :  { %851 = vmatmul.mubr.f32.gmra.mrb[12].mxu0 %v133_v6  ;;  %v2032_v40 = vpack.c.bf16 %v273_v35, %v271_v34  ;;  %v289_v6 = vld [vmem:[#allocation6 + $0x490] sm:$0xff]  ;;  %v299_v34 = vld [vmem:[#allocation6 + $0x4e0] sm:$0xff] }
  0xb2   :  { %856 = vmatprep.mubr.f32.mxu0 %v142_v8  ;;  %v292_v8 = vld [vmem:[#allocation6 + $0x4a8] sm:$0xff]  ;;  %v2048_v12 = vpack.c.bf16 %v289_v6, %v287_v5  ;;  %v301_v35 = vld [vmem:[#allocation6 + $0x4f0] sm:$0xff] }
  0xb3   :  { %2005 = vmatpush1.bf16.msra.mxu1 %v2004_v45  ;;  %v90_v45 = vld [vmem:[#allocation3 + $0x58] sm:$0xff] }
  0xb4   :  { %2007 = vmatprep.subr.bf16.mxu1 %v2006_v47  ;;  %v282_v47 = vld [vmem:[#allocation6 + $0x458] sm:$0xff] }
  0xb5   :  { %857 = vmatmul.mubr.f32.gmra.mrb[14].mxu0 %v141_v16  ;;  %v2038_v51 = vpack.c.bf16 %v282_v47, %v280_v46  ;;  %v293_v16 = vld [vmem:[#allocation6 + $0x4b0] sm:$0xff]  ;;  %v84_v46 = vld [vmem:[#allocation3 + $0x28] sm:$0xff] }
  0xb6   :  { %968 = vmatprep.mubr.f32.mxu0 %v2616_v23  ;;  %v2052_v20 = vpack.c.bf16 %v293_v16, %v291_v15  ;;  %v308_v47 = vld [vmem:[#allocation6 + $0x528] sm:$0xff]  ;;  %v323_v15 = vld [vmem:[#allocation6 + $0x5a0] sm:$0xff]  ;;  %v325_v16 = vld [vmem:[#allocation6 + $0x5b0] sm:$0xff] }
  0xb7   :  { %2009 = vmatpush1.bf16.msra.mxu1 %v2008_v54  ;;  %v98_v54 = vld [vmem:[#allocation3 + $0x98] sm:$0xff] }
  0xb8   :  { %2011 = vmatprep.subr.bf16.mxu1 %v2010_v56  ;;  %v286_v56 = vld [vmem:[#allocation6 + $0x478] sm:$0xff] }
  0xb9   :  { %969 = vmatmul.mubr.f32.vlgmr.msra.gmra.mrb[0].mxu0 %v2616_v23  ;;  %v2042_v60 = vpack.c.bf16 %v286_v56, %v284_v55  ;;  %v314_v55 = vld [vmem:[#allocation6 + $0x558] sm:$0xff]  ;;  %v2068_v56 = vpack.c.bf16 %v309_v53, %v307_v52  ;;  %v401_v53 = vlaneseq }
  0xba   :  { %2177 = vmatpush1.bf16.msra.mxu0 %v2720_v9  ;;  %1073 = vmatprep.mubr.f32.mxu0 %v2616_v23 }
  0xbb   :  { %2013 = vmatpush1.bf16.msra.mxu1 %v2012_v63  ;;  %2179 = vmatprep.subr.bf16.mxu0 %v2722_v11  ;;  %v106_v63 = vld [vmem:[#allocation3 + $0xd8] sm:$0xff] }
  0xbc   :  { %2015 = vmatprep.subr.bf16.mxu1 %v2014_v1  ;;  %v290_v1 = vld [vmem:[#allocation6 + $0x498] sm:$0xff] }
  0xbd   :  { %v2046_v4 = vpack.c.bf16 %v290_v1, %v288_v0  ;;  %v2074_v0 = vpack.c.bf16 %v318_v62, %v316_v61  ;;  %v315_v1 = vld [vmem:[#allocation6 + $0x560] sm:$0xff] }
  0xbe   :  { %2181 = vmatpush1.bf16.msra.mxu0 %v2725_v25 }
  0xbf   :  { %2017 = vmatpush1.bf16.msra.mxu1 %v2016_v7  ;;  %2183 = vmatprep.subr.bf16.mxu0 %v2728_v27  ;;  %v114_v7 = vld [vmem:[#allocation3 + $0x118] sm:$0xff] }
  0xc0   :  { %2019 = vmatprep.subr.bf16.mxu1 %v2018_v10  ;;  %v294_v10 = vld [vmem:[#allocation6 + $0x4b8] sm:$0xff] }
  0xc1   :  { %v2050_v14 = vpack.c.bf16 %v294_v10, %v292_v8  ;;  %v321_v8 = vld [vmem:[#allocation6 + $0x590] sm:$0xff]  ;;  %v324_v10 = vld [vmem:[#allocation6 + $0x5a8] sm:$0xff] }
  0xc2   :  { %2185 = vmatpush1.bf16.msra.mxu0 %v2731_v39 }
  0xc3   :  { %2021 = vmatpush1.bf16.msra.mxu1 %v2020_v17  ;;  %2187 = vmatprep.subr.bf16.mxu0 %v2734_v41  ;;  %v122_v17 = vld [vmem:[#allocation3 + $0x158] sm:$0xff] }
  0xc4   :  { %2023 = vmatprep.subr.bf16.mxu1 %v2022_v18  ;;  %v296_v18 = vld [vmem:[#allocation6 + $0x4c8] sm:$0xff] }
  0xc5   :  { %v2054_v22 = vpack.c.bf16 %v298_v19, %v296_v18  ;;  %v330_v18 = vld [vmem:[#allocation6 + $0x5d8] sm:$0xff]  ;;  %v2084_v19 = vpack.c.bf16 %v325_v16, %v323_v15 }
  0xc6   :  { %2189 = vmatpush1.bf16.msra.mxu0 %v2737_v50 }
  0xc7   :  { %2025 = vmatpush1.bf16.msra.mxu1 %v2024_v24  ;;  %2191 = vmatprep.subr.bf16.mxu0 %v2717_v58  ;;  %v295_v24 = vld [vmem:[#allocation6 + $0x4c0] sm:$0xff] }
  0xc8   :  { %2027 = vmatprep.subr.bf16.mxu1 %v2026_v26  ;;  %v297_v26 = vld [vmem:[#allocation6 + $0x4d0] sm:$0xff] }
  0xc9   :  { %v2056_v31 = vpack.c.bf16 %v297_v26, %v295_v24  ;;  %v332_v24 = vld [vmem:[#allocation6 + $0x5e8] sm:$0xff]  ;;  %v334_v26 = vld [vmem:[#allocation6 + $0x5f8] sm:$0xff] }
  0xcb   :  { %2029 = vmatpush1.bf16.msra.mxu1 %v2028_v32  ;;  %v129_v32 = vld [vmem:[#allocation3 + $0x190] sm:$0xff] }
  0xcc   :  { %2031 = vmatprep.subr.bf16.mxu1 %v2030_v33  ;;  %v2058_v33 = vpack.c.bf16 %v302_v30, %v300_v29  ;;  %v2090_v29 = vpack.c.bf16 %v334_v26, %v332_v24  ;;  %v331_v30 = vld [vmem:[#allocation6 + $0x5e0] sm:$0xff] }
  0xce   :  { %589 = vmatmul.mubr.f32.vlgmr.msra.gmra.mrb[0].mxu1 %v81_v38  ;;  %v306_v38 = vld [vmem:[#allocation6 + $0x518] sm:$0xff] }
  0xcf   :  { %2033 = vmatpush1.bf16.msra.mxu1 %v2032_v40  ;;  %594 = vmatprep.mubr.f32.mxu1 %v90_v45  ;;  %v2060_v40 = vpack.c.bf16 %v301_v35, %v299_v34  ;;  %v2062_v43 = vpack.c.bf16 %v306_v38, %v304_v37  ;;  %v305_v45 = vld [vmem:[#allocation6 + $0x510] sm:$0xff]  ;;  %v92_v34 = vld [vmem:[#allocation3 + $0x68] sm:$0xff]  ;;  %v91_v35 = vld [vmem:[#allocation3 + $0x60] sm:$0xff] }
  0xd0   :  { %2035 = vmatprep.subr.bf16.mxu1 %v2034_v42  ;;  %v137_v42 = vld [vmem:[#allocation3 + $0x1d0] sm:$0xff]  ;;  %v99_v37 = vld [vmem:[#allocation3 + $0xa0] sm:$0xff]  ;;  %v108_v38 = vld [vmem:[#allocation3 + $0xe8] sm:$0xff] }
  0xd2   :  { %595 = vmatmul.mubr.f32.gmra.mrb[2].mxu1 %v89_v49  ;;  %v2064_v49 = vpack.c.bf16 %v305_v45, %v303_v44  ;;  %v124_v44 = vld [vmem:[#allocation3 + $0x168] sm:$0xff]  ;;  %v123_v45 = vld [vmem:[#allocation3 + $0x160] sm:$0xff] }
  0xd3   :  { %2037 = vmatpush1.bf16.msra.mxu1 %v2036_v48  ;;  %600 = vmatprep.mubr.f32.mxu1 %v98_v54  ;;  %v310_v48 = vld [vmem:[#allocation6 + $0x538] sm:$0xff]  ;;  %v312_v54 = vld [vmem:[#allocation6 + $0x548] sm:$0xff] }
  0xd4   :  { %2039 = vmatprep.subr.bf16.mxu1 %v2038_v51  ;;  %v2066_v51 = vpack.c.bf16 %v310_v48, %v308_v47  ;;  %v131_v47 = vld [vmem:[#allocation3 + $0x1a0] sm:$0xff]  ;;  %v140_v48 = vld [vmem:[#allocation3 + $0x1e8] sm:$0xff] }
  0xd6   :  { %601 = vmatmul.mubr.f32.gmra.mrb[4].mxu1 %v97_v59  ;;  %v311_v59 = vld [vmem:[#allocation6 + $0x540] sm:$0xff] }
  0xd7   :  { %2041 = vmatpush1.bf16.msra.mxu1 %v2040_v57  ;;  %606 = vmatprep.mubr.f32.mxu1 %v106_v63  ;;  %v2070_v57 = vpack.c.bf16 %v314_v55, %v312_v54  ;;  %v402_v54 = vshrl.u32 %v401_v53, 7 }
  0xd8   :  { %2043 = vmatprep.subr.bf16.mxu1 %v2042_v60  ;;  %v313_v60 = vld [vmem:[#allocation6 + $0x550] sm:$0xff] }
  0xd9   :  { %v2072_v63 = vpack.c.bf16 %v313_v60, %v311_v59  ;;  %v403_v55 = vsub.s32 0, %v402_v54 }
  0xda   :  { %607 = vmatmul.mubr.f32.gmra.mrb[6].mxu1 %v105_v3  ;;  %v320_v3 = vld [vmem:[#allocation6 + $0x588] sm:$0xff] }
  0xdb   :  { %2045 = vmatpush1.bf16.msra.mxu1 %v2044_v2  ;;  %612 = vmatprep.mubr.f32.mxu1 %v114_v7  ;;  %v317_v2 = vld [vmem:[#allocation6 + $0x570] sm:$0xff]  ;;  %v319_v7 = vld [vmem:[#allocation6 + $0x580] sm:$0xff] }
  0xdc   :  { %2047 = vmatprep.subr.bf16.mxu1 %v2046_v4  ;;  %v322_v4 = vld [vmem:[#allocation6 + $0x598] sm:$0xff]  ;;  %v2076_v5 = vpack.c.bf16 %v317_v2, %v315_v1 }
  0xdd   :  { %v2078_v6 = vpack.c.bf16 %v322_v4, %v320_v3 }
  0xde   :  { %613 = vmatmul.mubr.f32.gmra.mrb[8].mxu1 %v113_v13  ;;  %v2080_v13 = vpack.c.bf16 %v321_v8, %v319_v7 }
  0xdf   :  { %2049 = vmatpush1.bf16.msra.mxu1 %v2048_v12  ;;  %618 = vmatprep.mubr.f32.mxu1 %v122_v17  ;;  %v326_v12 = vld [vmem:[#allocation6 + $0x5b8] sm:$0xff]  ;;  %v328_v17 = vld [vmem:[#allocation6 + $0x5c8] sm:$0xff] }
  0xe0   :  { %2051 = vmatprep.subr.bf16.mxu1 %v2050_v14  ;;  %v2082_v14 = vpack.c.bf16 %v326_v12, %v324_v10 }
  0xe2   :  { %619 = vmatmul.mubr.f32.gmra.mrb[10].mxu1 %v121_v21  ;;  %v327_v21 = vld [vmem:[#allocation6 + $0x5c0] sm:$0xff] }
  0xe3   :  { %2053 = vmatpush1.bf16.msra.mxu1 %v2052_v20  ;;  %624 = vmatprep.mubr.f32.mxu1 %v130_v28  ;;  %v2086_v20 = vpack.c.bf16 %v330_v18, %v328_v17 }
  0xe4   :  { %2055 = vmatprep.subr.bf16.mxu1 %v2054_v22  ;;  %v329_v22 = vld [vmem:[#allocation6 + $0x5d0] sm:$0xff] }
  0xe5   :  { %v2088_v28 = vpack.c.bf16 %v329_v22, %v327_v21 }
  0xe6   :  { %625 = vmatmul.mubr.f32.gmra.mrb[12].mxu1 %v129_v32 }
  0xe7   :  { %2057 = vmatpush1.bf16.msra.mxu1 %v2056_v31  ;;  %630 = vmatprep.mubr.f32.mxu1 %v138_v36  ;;  %v333_v31 = vld [vmem:[#allocation6 + $0x5f0] sm:$0xff]  ;;  %v100_v36 = vld [vmem:[#allocation3 + $0xa8] sm:$0xff] }
  0xe8   :  { %2059 = vmatprep.subr.bf16.mxu1 %v2058_v33  ;;  %v2092_v32 = vpack.c.bf16 %v333_v31, %v331_v30  ;;  %v83_v33 = vld [vmem:[#allocation3 + $0x20] sm:$0xff] }
  0xea   :  { %631 = vmatmul.mubr.f32.gmra.mrb[14].mxu1 %v137_v42  ;;  %v116_v42 = vld [vmem:[#allocation3 + $0x128] sm:$0xff] }
  0xeb   :  { %2061 = vmatpush1.bf16.msra.mxu1 %v2060_v40  ;;  %701 = vmatprep.mubr.f32.mxu1 %v84_v46  ;;  %v107_v40 = vld [vmem:[#allocation3 + $0xe0] sm:$0xff]  ;;  %v132_v46 = vld [vmem:[#allocation3 + $0x1a8] sm:$0xff] }
  0xec   :  { %2063 = vmatprep.subr.bf16.mxu1 %v2062_v43  ;;  %v115_v43 = vld [vmem:[#allocation3 + $0x120] sm:$0xff] }
  0xef   :  { %2065 = vmatpush1.bf16.msra.mxu1 %v2064_v49  ;;  %v139_v49 = vld [vmem:[#allocation3 + $0x1e0] sm:$0xff] }
  0xf0   :  { %2067 = vmatprep.subr.bf16.mxu1 %v2066_v51 }
  0xf3   :  { %2069 = vmatpush1.bf16.msra.mxu1 %v2068_v56  ;;  %v399_v56 = vld [vmem:[%s2888_s3] sm:$0x3] }
  0xf4   :  { %2071 = vmatprep.subr.bf16.mxu1 %v2070_v57  ;;  %v407_v57 = vsub.s32 1, %v402_v54  ;;  %v404_v59 = vrot.slane %v399_v56, %v403_v55 }
  0xf6   :  { %v408_v60 = vrot.slane %v399_v56, %v407_v57 }
  0xf7   :  { %2073 = vmatpush1.bf16.msra.mxu1 %v2072_v63 }
  0xf8   :  { %2075 = vmatprep.subr.bf16.mxu1 %v2074_v0 }
  0xfb   :  { %2077 = vmatpush1.bf16.msra.mxu1 %v2076_v5 }
  0xfc   :  { %2079 = vmatprep.subr.bf16.mxu1 %v2078_v6 }
  0xff   :  { %2081 = vmatpush1.bf16.msra.mxu1 %v2080_v13 }
 0x100   :  { %2083 = vmatprep.subr.bf16.mxu1 %v2082_v14 }
 0x103   :  { %2085 = vmatpush1.bf16.msra.mxu1 %v2084_v19 }
 0x104   :  { %2087 = vmatprep.subr.bf16.mxu1 %v2086_v20 }
 0x107   :  { %2089 = vmatpush1.bf16.msra.mxu1 %v2088_v28 }
 0x108   :  { %2091 = vmatprep.subr.bf16.mxu1 %v2090_v29 }
 0x10b   :  { %2093 = vmatpush1.bf16.msra.mxu1 %v2092_v32 }
 0x10e   :  { %702 = vmatmul.mubr.f32.vlgmr.msra.gmra.mrb[0].mxu1 %v83_v33 }
 0x10f   :  { %707 = vmatprep.mubr.f32.mxu1 %v92_v34 }
 0x112   :  { %708 = vmatmul.mubr.f32.gmra.mrb[2].mxu1 %v91_v35 }
 0x113   :  { %713 = vmatprep.mubr.f32.mxu1 %v100_v36 }
 0x116   :  { %714 = vmatmul.mubr.f32.gmra.mrb[4].mxu1 %v99_v37 }
 0x117   :  { %719 = vmatprep.mubr.f32.mxu1 %v108_v38 }
 0x11a   :  { %720 = vmatmul.mubr.f32.gmra.mrb[6].mxu1 %v107_v40 }
 0x11b   :  { %725 = vmatprep.mubr.f32.mxu1 %v116_v42 }
 0x11e   :  { %726 = vmatmul.mubr.f32.gmra.mrb[8].mxu1 %v115_v43 }
 0x11f   :  { %731 = vmatprep.mubr.f32.mxu1 %v124_v44 }
 0x122   :  { %732 = vmatmul.mubr.f32.gmra.mrb[10].mxu1 %v123_v45 }
 0x123   :  { %737 = vmatprep.mubr.f32.mxu1 %v132_v46 }
 0x126   :  { %738 = vmatmul.mubr.f32.gmra.mrb[12].mxu1 %v131_v47 }
 0x127   :  { %743 = vmatprep.mubr.f32.mxu1 %v140_v48 }
 0x12a   :  { %744 = vmatmul.mubr.f32.gmra.mrb[14].mxu1 %v139_v49 }
 0x12b   :  { %1899 = vmatprep.mubr.msk.f32.mxu1 %vm2618_vm1, %v2616_v23 }
 0x18c   :  { %v970_v51 = vpop.f32.mrb[0].mxu0 }
 0x18d   :  { %v972_v52 = vpop.f32.mrb[1].mxu0 }
 0x1e1   :  { %v703_v61 = vpop.f32.mrb[0].mxu1 }
 0x1e2   :  { %v2298_v62 = vadd.f32 %v703_v61, %v404_v59  ;;  %v705_v63 = vpop.f32.mrb[1].mxu1 }
 0x1e3   :  { %v2300_v0 = vadd.f32 %v705_v63, %v408_v60 }
 0x1e4   :  { %v2299_v1 = vadd.f32 %v2298_v62, %v970_v51 }
 0x1e5   :  { %v2301_v2 = vadd.f32 %v2300_v0, %v972_v52  ;;  %v709_v3 = vpop.f32.mrb[2].mxu1 }
 0x1e6   :  { %v1849_v4 = vmul.f32 -1.442695, %v2299_v1  ;;  %v2302_v5 = vadd.f32 %v709_v3, %v404_v59  ;;  %v711_v6 = vpop.f32.mrb[3].mxu1 }
 0x1e7   :  { %v2304_v7 = vadd.f32 %v711_v6, %v408_v60  ;;  %v1850_v44 = vmul.f32 -1.442695, %v2301_v2 }
 0x1e8   :  { %2392 = vpow2.f32 %v1849_v4 }
 0x1e9   :  { %v715_v8 = vpop.f32.mrb[4].mxu1  ;;  %2394 = vtanh.f32 %v2301_v2 }
 0x1ea   :  { %v2756_v10 = vadd.f32 %v715_v8, %v404_v59  ;;  %v717_v12 = vpop.f32.mrb[5].mxu1 }
 0x1eb   :  { %v2758_v13 = vadd.f32 %v717_v12, %v408_v60 }
 0x1ed   :  { %v721_v14 = vpop.f32.mrb[6].mxu1 }
 0x1ee   :  { %v2760_v15 = vadd.f32 %v721_v14, %v404_v59  ;;  %v723_v16 = vpop.f32.mrb[7].mxu1 }
 0x1ef   :  { %v2762_v17 = vadd.f32 %v723_v16, %v408_v60 }
 0x1f1   :  { %v727_v18 = vpop.f32.mrb[8].mxu1 }
 0x1f2   :  { %v2393_v19 = vpop.eup %2392  ;;  %v2764_v20 = vadd.f32 %v727_v18, %v404_v59  ;;  %v729_v21 = vpop.f32.mrb[9].mxu1 }
 0x1f3   :  { %v983_v22 = vadd.f32 1.0, %v2393_v19  ;;  %v2766_v24 = vadd.f32 %v729_v21, %v408_v60  ;;  %v2395_v36 = vpop.eup %2394 }
 0x1f5   :  { %2396 = vrcp.f32 %v983_v22  ;;  %v733_v26 = vpop.f32.mrb[10].mxu1 }
 0x1f6   :  { %v2768_v28 = vadd.f32 %v733_v26, %v404_v59  ;;  %v735_v29 = vpop.f32.mrb[11].mxu1  ;;  %2398 = vpow2.f32 %v1850_v44 }
 0x1f7   :  { %v2770_v30 = vadd.f32 %v735_v29, %v408_v60 }
 0x1f9   :  { %v739_v31 = vpop.f32.mrb[12].mxu1 }
 0x1fa   :  { %v2772_v32 = vadd.f32 %v739_v31, %v404_v59  ;;  %v741_v33 = vpop.f32.mrb[13].mxu1 }
 0x1fb   :  { %v2774_v34 = vadd.f32 %v741_v33, %v408_v60 }
 0x1fd   :  { %v745_v35 = vpop.f32.mrb[14].mxu1 }
 0x1fe   :  { %v2776_v37 = vadd.f32 %v745_v35, %v404_v59  ;;  %v747_v38 = vpop.f32.mrb[15].mxu1 }
 0x1ff   :  { %v2397_v40 = vpop.eup %2396  ;;  %v2778_v42 = vadd.f32 %v747_v38, %v408_v60 }
 0x200   :  { %v991_v43 = vmul.f32 %v2397_v40, %v2395_v36  ;;  %v2399_v45 = vpop.eup %2398  ;;  %v990_v47 = vmul.f32 0.0, %v2397_v40 }
 0x201   :  { %v984_v46 = vadd.f32 1.0, %v2399_v45 }
 0x202   :  { %993 = vrot.lane.b32.xlu0 %v991_v43, %s2611_s21 }
 0x203   :  { %2400 = vrcp.f32 %v984_v46 }
 0x20d   :  { %v2401_v51 = vpop.eup %2400 }
 0x274   :  { %v994_v48 = vpop.permute.xlu0 %993 }
 0x275   :  { %v996_v49 = vadd.f32 %v994_v48, %v990_v47 }
 0x277   :  { %2402 = vtanh.f32 %v996_v49 }
 0x281   :  { %v2403_v52 = vpop.eup %2402 }
 0x282   :  { %v998_v53 = vmul.f32 %v2403_v52, %v2401_v51 }
 0x284   :  { %1005 = vrot.lane.b32.xlu0 %v998_v53, %s2611_s21 }
 0x2f6   :  { %v1006_v54 = vpop.permute.xlu0 %1005 }
 0x2f7   :  { %1851 = vmatmul.mubr.msk.f32.vlgmr.msra.gmra.mrb[2].mxu0 %vm900_vm0, %v1006_v54 }
 0x2f8   :  { %2193 = vmatpush1.bf16.msra.mxu0 %v2720_v9  ;;  %1178 = vmatprep.mubr.f32.mxu0 %v2616_v23 }
 0x2f9   :  { %2195 = vmatprep.subr.bf16.mxu0 %v2722_v11 }
 0x2fc   :  { %2197 = vmatpush1.bf16.msra.mxu0 %v2725_v25 }
 0x2fd   :  { %2199 = vmatprep.subr.bf16.mxu0 %v2728_v27 }
 0x300   :  { %2201 = vmatpush1.bf16.msra.mxu0 %v2731_v39 }
 0x301   :  { %2203 = vmatprep.subr.bf16.mxu0 %v2734_v41 }
 0x304   :  { %2205 = vmatpush1.bf16.msra.mxu0 %v2737_v50 }
 0x305   :  { %2207 = vmatprep.subr.bf16.mxu0 %v2717_v58 }
 0x3ca   :  { %v1075_v55 = vpop.f32.mrb[2].mxu0 }
 0x3cb   :  { %v2303_v56 = vadd.f32 %v2302_v5, %v1075_v55  ;;  %v1077_v57 = vpop.f32.mrb[3].mxu0 }
 0x3cc   :  { %v2305_v59 = vadd.f32 %v2304_v7, %v1077_v57 }
 0x3cd   :  { %v1852_v60 = vmul.f32 -1.442695, %v2303_v56 }
 0x3ce   :  { %v1853_v2 = vmul.f32 -1.442695, %v2305_v59 }
 0x3cf   :  { %2404 = vpow2.f32 %v1852_v60 }
 0x3d0   :  { %2406 = vtanh.f32 %v2305_v59 }
 0x3d9   :  { %v2405_v61 = vpop.eup %2404 }
 0x3da   :  { %v1088_v62 = vadd.f32 1.0, %v2405_v61  ;;  %v2407_v63 = vpop.eup %2406 }
 0x3dc   :  { %2408 = vrcp.f32 %v1088_v62 }
 0x3dd   :  { %2410 = vpow2.f32 %v1853_v2 }
 0x3e6   :  { %v2409_v0 = vpop.eup %2408 }
 0x3e7   :  { %v1096_v1 = vmul.f32 %v2409_v0, %v2407_v63  ;;  %v2411_v3 = vpop.eup %2410  ;;  %v1095_v6 = vmul.f32 %v2409_v0, %v996_v49 }
 0x3e8   :  { %v1089_v4 = vadd.f32 1.0, %v2411_v3 }
 0x3e9   :  { %1098 = vrot.lane.b32.xlu1 %v1096_v1, %s2611_s21 }
 0x3ea   :  { %2412 = vrcp.f32 %v1089_v4 }
 0x3f4   :  { %v2413_v7 = vpop.eup %2412 }
 0x45b   :  { %v1099_v8 = vpop.permute.xlu1 %1098 }
 0x45c   :  { %v1101_v5 = vadd.f32 %v1099_v8, %v1095_v6 }
 0x45e   :  { %2414 = vtanh.f32 %v1101_v5 }
 0x468   :  { %v2415_v12 = vpop.eup %2414 }
 0x469   :  { %v1103_v14 = vmul.f32 %v2415_v12, %v2413_v7 }
 0x46b   :  { %1110 = vrot.lane.b32.xlu1 %v1103_v14, %s2611_s21 }
 0x4dd   :  { %v1111_v16 = vpop.permute.xlu1 %1110 }
 0x4de   :  { %1854 = vmatmul.mubr.msk.f32.vlgmr.msra.gmra.mrb[4].mxu0 %vm900_vm0, %v1111_v16 }
 0x4df   :  { %2209 = vmatpush1.bf16.msra.mxu0 %v2720_v9  ;;  %1283 = vmatprep.mubr.f32.mxu0 %v2616_v23 }
 0x4e0   :  { %2211 = vmatprep.subr.bf16.mxu0 %v2722_v11 }
 0x4e3   :  { %2213 = vmatpush1.bf16.msra.mxu0 %v2725_v25 }
 0x4e4   :  { %2215 = vmatprep.subr.bf16.mxu0 %v2728_v27 }
 0x4e7   :  { %2217 = vmatpush1.bf16.msra.mxu0 %v2731_v39 }
 0x4e8   :  { %2219 = vmatprep.subr.bf16.mxu0 %v2734_v41 }
 0x4eb   :  { %2221 = vmatpush1.bf16.msra.mxu0 %v2737_v50 }
 0x4ec   :  { %2223 = vmatprep.subr.bf16.mxu0 %v2717_v58 }
 0x5b1   :  { %v1180_v18 = vpop.f32.mrb[4].mxu0 }
 0x5b2   :  { %v2307_v19 = vadd.f32 %v2756_v10, %v1180_v18  ;;  %v1182_v21 = vpop.f32.mrb[5].mxu0 }
 0x5b3   :  { %v2309_v22 = vadd.f32 %v2758_v13, %v1182_v21 }
 0x5b4   :  { %v1855_v26 = vmul.f32 -1.442695, %v2307_v19 }
 0x5b5   :  { %v1856_v38 = vmul.f32 -1.442695, %v2309_v22 }
 0x5b6   :  { %2416 = vpow2.f32 %v1855_v26 }
 0x5b7   :  { %2418 = vtanh.f32 %v2309_v22 }
 0x5c0   :  { %v2417_v29 = vpop.eup %2416 }
 0x5c1   :  { %v1193_v31 = vadd.f32 1.0, %v2417_v29  ;;  %v2419_v33 = vpop.eup %2418 }
 0x5c3   :  { %2420 = vrcp.f32 %v1193_v31 }
 0x5c4   :  { %2422 = vpow2.f32 %v1856_v38 }
 0x5cd   :  { %v2421_v35 = vpop.eup %2420 }
 0x5ce   :  { %v1201_v36 = vmul.f32 %v2421_v35, %v2419_v33  ;;  %v2423_v40 = vpop.eup %2422  ;;  %v1200_v44 = vmul.f32 %v2421_v35, %v1101_v5 }
 0x5cf   :  { %v1194_v43 = vadd.f32 1.0, %v2423_v40 }
 0x5d0   :  { %1203 = vrot.lane.b32.xlu0 %v1201_v36, %s2611_s21 }
 0x5d1   :  { %2424 = vrcp.f32 %v1194_v43 }
 0x5db   :  { %v2425_v13 = vpop.eup %2424 }
 0x642   :  { %v1204_v10 = vpop.permute.xlu0 %1203 }
 0x643   :  { %v1206_v45 = vadd.f32 %v1204_v10, %v1200_v44 }
 0x645   :  { %2426 = vtanh.f32 %v1206_v45 }
 0x64f   :  { %v2427_v46 = vpop.eup %2426 }
 0x650   :  { %v1208_v47 = vmul.f32 %v2427_v46, %v2425_v13 }
 0x652   :  { %1215 = vrot.lane.b32.xlu1 %v1208_v47, %s2611_s21 }
 0x6c4   :  { %v1216_v48 = vpop.permute.xlu1 %1215 }
 0x6c5   :  { %1857 = vmatmul.mubr.msk.f32.vlgmr.msra.gmra.mrb[6].mxu0 %vm900_vm0, %v1216_v48 }
 0x6c6   :  { %2225 = vmatpush1.bf16.msra.mxu0 %v2720_v9  ;;  %1388 = vmatprep.mubr.f32.mxu0 %v2616_v23 }
 0x6c7   :  { %2227 = vmatprep.subr.bf16.mxu0 %v2722_v11 }
 0x6ca   :  { %2229 = vmatpush1.bf16.msra.mxu0 %v2725_v25 }
 0x6cb   :  { %2231 = vmatprep.subr.bf16.mxu0 %v2728_v27 }
 0x6ce   :  { %2233 = vmatpush1.bf16.msra.mxu0 %v2731_v39 }
 0x6cf   :  { %2235 = vmatprep.subr.bf16.mxu0 %v2734_v41 }
 0x6d2   :  { %2237 = vmatpush1.bf16.msra.mxu0 %v2737_v50 }
 0x6d3   :  { %2239 = vmatprep.subr.bf16.mxu0 %v2717_v58 }
 0x798   :  { %v1285_v49 = vpop.f32.mrb[6].mxu0 }
 0x799   :  { %v2311_v51 = vadd.f32 %v2760_v15, %v1285_v49  ;;  %v1287_v52 = vpop.f32.mrb[7].mxu0 }
 0x79a   :  { %v2313_v53 = vadd.f32 %v2762_v17, %v1287_v52 }
 0x79b   :  { %v1858_v54 = vmul.f32 -1.442695, %v2311_v51 }
 0x79c   :  { %v1859_v61 = vmul.f32 -1.442695, %v2313_v53 }
 0x79d   :  { %2428 = vpow2.f32 %v1858_v54 }
 0x79e   :  { %2430 = vtanh.f32 %v2313_v53 }
 0x7a7   :  { %v2429_v55 = vpop.eup %2428 }
 0x7a8   :  { %v1298_v56 = vadd.f32 1.0, %v2429_v55  ;;  %v2431_v57 = vpop.eup %2430 }
 0x7aa   :  { %2432 = vrcp.f32 %v1298_v56 }
 0x7ab   :  { %2434 = vpow2.f32 %v1859_v61 }
 0x7b4   :  { %v2433_v59 = vpop.eup %2432 }
 0x7b5   :  { %v1306_v60 = vmul.f32 %v2433_v59, %v2431_v57  ;;  %v2435_v62 = vpop.eup %2434  ;;  %v1305_v0 = vmul.f32 %v2433_v59, %v1206_v45 }
 0x7b6   :  { %v1299_v63 = vadd.f32 1.0, %v2435_v62 }
 0x7b7   :  { %1308 = vrot.lane.b32.xlu0 %v1306_v60, %s2611_s21 }
 0x7b8   :  { %2436 = vrcp.f32 %v1299_v63 }
 0x7c2   :  { %v2437_v17 = vpop.eup %2436 }
 0x829   :  { %v1309_v15 = vpop.permute.xlu0 %1308 }
 0x82a   :  { %v1311_v1 = vadd.f32 %v1309_v15, %v1305_v0 }
 0x82c   :  { %2438 = vtanh.f32 %v1311_v1 }
 0x836   :  { %v2439_v2 = vpop.eup %2438 }
 0x837   :  { %v1313_v3 = vmul.f32 %v2439_v2, %v2437_v17 }
 0x839   :  { %1320 = vrot.lane.b32.xlu1 %v1313_v3, %s2611_s21 }
 0x8ab   :  { %v1321_v4 = vpop.permute.xlu1 %1320 }
 0x8ac   :  { %1860 = vmatmul.mubr.msk.f32.vlgmr.msra.gmra.mrb[8].mxu0 %vm900_vm0, %v1321_v4 }
 0x8ad   :  { %2241 = vmatpush1.bf16.msra.mxu0 %v2720_v9  ;;  %1493 = vmatprep.mubr.f32.mxu0 %v2616_v23 }
 0x8ae   :  { %2243 = vmatprep.subr.bf16.mxu0 %v2722_v11 }
 0x8b1   :  { %2245 = vmatpush1.bf16.msra.mxu0 %v2725_v25 }
 0x8b2   :  { %2247 = vmatprep.subr.bf16.mxu0 %v2728_v27 }
 0x8b5   :  { %2249 = vmatpush1.bf16.msra.mxu0 %v2731_v39 }
 0x8b6   :  { %2251 = vmatprep.subr.bf16.mxu0 %v2734_v41 }
 0x8b9   :  { %2253 = vmatpush1.bf16.msra.mxu0 %v2737_v50 }
 0x8ba   :  { %2255 = vmatprep.subr.bf16.mxu0 %v2717_v58 }
 0x97f   :  { %v1390_v6 = vpop.f32.mrb[8].mxu0 }
 0x980   :  { %v2315_v8 = vadd.f32 %v2764_v20, %v1390_v6  ;;  %v1392_v5 = vpop.f32.mrb[9].mxu0 }
 0x981   :  { %v2317_v7 = vadd.f32 %v2766_v24, %v1392_v5 }
 0x982   :  { %v1861_v12 = vmul.f32 -1.442695, %v2315_v8 }
 0x983   :  { %v1862_v22 = vmul.f32 -1.442695, %v2317_v7 }
 0x984   :  { %2440 = vpow2.f32 %v1861_v12 }
 0x985   :  { %2442 = vtanh.f32 %v2317_v7 }
 0x98e   :  { %v2441_v14 = vpop.eup %2440 }
 0x98f   :  { %v1403_v16 = vadd.f32 1.0, %v2441_v14  ;;  %v2443_v18 = vpop.eup %2442 }
 0x991   :  { %2444 = vrcp.f32 %v1403_v16 }
 0x992   :  { %2446 = vpow2.f32 %v1862_v22  ;;  %v1735_v22 = vld [vmem:[#allocation9 + $0x8] sm:$0xff] }
 0x99b   :  { %v2445_v19 = vpop.eup %2444 }
 0x99c   :  { %v1411_v21 = vmul.f32 %v2445_v19, %v2443_v18  ;;  %v2447_v26 = vpop.eup %2446  ;;  %v1410_v31 = vmul.f32 %v2445_v19, %v1311_v1 }
 0x99d   :  { %v1404_v29 = vadd.f32 1.0, %v2447_v26  ;;  %v1736_v26 = vld [vmem:[#allocation9 + $0x10] sm:$0xff] }
 0x99e   :  { %1413 = vrot.lane.b32.xlu0 %v1411_v21, %s2611_s21  ;;  %v1734_v21 = vld [vmem:[#allocation9] sm:$0xff] }
 0x99f   :  { %2448 = vrcp.f32 %v1404_v29  ;;  %v2617_v29 = vmov 0.0|0.0  }
 0x9a0   :  { %2286 = vmatprep.subr.bf16.mxu1 %v2617_v29 }
 0x9a9   :  { %v2449_v24 = vpop.eup %2448 }
 0xa10   :  { %v1414_v20 = vpop.permute.xlu0 %1413 }
 0xa11   :  { %v1416_v33 = vadd.f32 %v1414_v20, %v1410_v31  ;;  %v1737_v31 = vld [vmem:[#allocation9 + $0x18] sm:$0xff]  ;;  %v1738_v20 = vld [vmem:[#allocation9 + $0x20] sm:$0xff] }
 0xa13   :  { %2450 = vtanh.f32 %v1416_v33 }
 0xa1d   :  { %v2451_v35 = vpop.eup %2450 }
 0xa1e   :  { %v1418_v36 = vmul.f32 %v2451_v35, %v2449_v24  ;;  %v1740_v35 = vld [vmem:[#allocation9 + $0x30] sm:$0xff] }
 0xa20   :  { %1425 = vrot.lane.b32.xlu1 %v1418_v36, %s2611_s21  ;;  %v1741_v36 = vld [vmem:[#allocation9 + $0x38] sm:$0xff] }
 0xa92   :  { %v1426_v38 = vpop.permute.xlu1 %1425 }
 0xa93   :  { %1863 = vmatmul.mubr.msk.f32.vlgmr.msra.gmra.mrb[10].mxu0 %vm900_vm0, %v1426_v38  ;;  %v2296_v38 = vpack.c.bf16 %v1741_v36, %v1740_v35 }
 0xa94   :  { %2257 = vmatpush1.bf16.msra.mxu0 %v2720_v9  ;;  %1598 = vmatprep.mubr.f32.mxu0 %v2616_v23 }
 0xa95   :  { %2259 = vmatprep.subr.bf16.mxu0 %v2722_v11 }
 0xa98   :  { %2261 = vmatpush1.bf16.msra.mxu0 %v2725_v25 }
 0xa99   :  { %2263 = vmatprep.subr.bf16.mxu0 %v2728_v27 }
 0xa9c   :  { %2265 = vmatpush1.bf16.msra.mxu0 %v2731_v39 }
 0xa9d   :  { %2267 = vmatprep.subr.bf16.mxu0 %v2734_v41 }
 0xaa0   :  { %2269 = vmatpush1.bf16.msra.mxu0 %v2737_v50 }
 0xaa1   :  { %2271 = vmatprep.subr.bf16.mxu0 %v2717_v58 }
 0xb66   :  { %v1495_v40 = vpop.f32.mrb[10].mxu0 }
 0xb67   :  { %v2319_v43 = vadd.f32 %v2768_v28, %v1495_v40  ;;  %v1497_v44 = vpop.f32.mrb[11].mxu0 }
 0xb68   :  { %v2321_v10 = vadd.f32 %v2770_v30, %v1497_v44 }
 0xb69   :  { %v1864_v45 = vmul.f32 -1.442695, %v2319_v43 }
 0xb6a   :  { %v1865_v51 = vmul.f32 -1.442695, %v2321_v10 }
 0xb6b   :  { %2452 = vpow2.f32 %v1864_v45 }
 0xb6c   :  { %2454 = vtanh.f32 %v2321_v10 }
 0xb75   :  { %v2453_v13 = vpop.eup %2452 }
 0xb76   :  { %v1508_v46 = vadd.f32 1.0, %v2453_v13  ;;  %v2455_v47 = vpop.eup %2454 }
 0xb78   :  { %2456 = vrcp.f32 %v1508_v46 }
 0xb79   :  { %2458 = vpow2.f32 %v1865_v51 }
 0xb82   :  { %v2457_v48 = vpop.eup %2456 }
 0xb83   :  { %v1516_v49 = vmul.f32 %v2457_v48, %v2455_v47  ;;  %v2459_v58 = vpop.eup %2458  ;;  %v1515_v53 = vmul.f32 %v2457_v48, %v1416_v33  ;;  %v1739_v33 = vld [vmem:[#allocation9 + $0x28] sm:$0xff] }
 0xb84   :  { %v1509_v52 = vadd.f32 1.0, %v2459_v58  ;;  %v2293_v24 = vpack.c.bf16 %v1739_v33, %v1738_v20 }
 0xb85   :  { %1518 = vrot.lane.b32.xlu0 %v1516_v49, %s2611_s21  ;;  %v1872_v49 = vld [vmem:[%s2890_s5] ss:$0 sm:$0xff] }
 0xb86   :  { %2460 = vrcp.f32 %v1509_v52 }
 0xb90   :  { %v2461_v30 = vpop.eup %2460 }
 0xbf7   :  { %v1519_v28 = vpop.permute.xlu0 %1518 }
 0xbf8   :  { %v1521_v54 = vadd.f32 %v1519_v28, %v1515_v53 }
 0xbfa   :  { %2462 = vtanh.f32 %v1521_v54 }
 0xc04   :  { %v2463_v55 = vpop.eup %2462 }
 0xc05   :  { %v1523_v56 = vmul.f32 %v2463_v55, %v2461_v30 }
 0xc07   :  { %1530 = vrot.lane.b32.xlu1 %v1523_v56, %s2611_s21 }
 0xc79   :  { %v1531_v57 = vpop.permute.xlu1 %1530 }
 0xc7a   :  { %1866 = vmatmul.mubr.msk.f32.vlgmr.msra.gmra.mrb[12].mxu0 %vm900_vm0, %v1531_v57 }
 0xc7b   :  { %2273 = vmatpush1.bf16.msra.mxu0 %v2720_v9  ;;  %1703 = vmatprep.mubr.f32.mxu0 %v2616_v23 }
 0xc7c   :  { %2275 = vmatprep.subr.bf16.mxu0 %v2722_v11 }
 0xc7f   :  { %2277 = vmatpush1.bf16.msra.mxu0 %v2725_v25 }
 0xc80   :  { %2279 = vmatprep.subr.bf16.mxu0 %v2728_v27 }
 0xc83   :  { %2281 = vmatpush1.bf16.msra.mxu0 %v2731_v39 }
 0xc84   :  { %2283 = vmatprep.subr.bf16.mxu0 %v2734_v41 }
 0xc87   :  { %2285 = vmatpush1.bf16.msra.mxu0 %v2737_v50 }
 0xd4d   :  { %v1600_v59 = vpop.f32.mrb[12].mxu0 }
 0xd4e   :  { %v2323_v60 = vadd.f32 %v2772_v32, %v1600_v59  ;;  %v1602_v61 = vpop.f32.mrb[13].mxu0 }
 0xd4f   :  { %v2325_v9 = vadd.f32 %v2774_v34, %v1602_v61 }
 0xd50   :  { %v1867_v62 = vmul.f32 -1.442695, %v2323_v60 }
 0xd51   :  { %v1868_v39 = vmul.f32 -1.442695, %v2325_v9 }
 0xd52   :  { %2464 = vpow2.f32 %v1867_v62 }
 0xd53   :  { %2466 = vtanh.f32 %v2325_v9 }
 0xd5c   :  { %v2465_v63 = vpop.eup %2464 }
 0xd5d   :  { %v1613_v11 = vadd.f32 1.0, %v2465_v63  ;;  %v2467_v25 = vpop.eup %2466 }
 0xd5f   :  { %2468 = vrcp.f32 %v1613_v11 }
 0xd60   :  { %2470 = vpow2.f32 %v1868_v39 }
 0xd69   :  { %v2469_v27 = vpop.eup %2468 }
 0xd6a   :  { %v1621_v0 = vmul.f32 %v2469_v27, %v2467_v25  ;;  %v2471_v41 = vpop.eup %2470  ;;  %v1620_v15 = vmul.f32 %v2469_v27, %v1521_v54 }
 0xd6b   :  { %v1614_v50 = vadd.f32 1.0, %v2471_v41 }
 0xd6c   :  { %1623 = vrot.lane.b32.xlu0 %v1621_v0, %s2611_s21 }
 0xd6d   :  { %2472 = vrcp.f32 %v1614_v50 }
 0xd77   :  { %v2473_v34 = vpop.eup %2472 }
 0xdde   :  { %v1624_v32 = vpop.permute.xlu0 %1623 }
 0xddf   :  { %v1626_v1 = vadd.f32 %v1624_v32, %v1620_v15 }
 0xde1   :  { %2474 = vtanh.f32 %v1626_v1 }
 0xdeb   :  { %v2475_v17 = vpop.eup %2474 }
 0xdec   :  { %v1628_v2 = vmul.f32 %v2475_v17, %v2473_v34 }
 0xdee   :  { %1635 = vrot.lane.b32.xlu1 %v1628_v2, %s2611_s21 }
 0xe60   :  { %v1636_v3 = vpop.permute.xlu1 %1635 }
 0xe61   :  { %1869 = vmatmul.mubr.msk.f32.vlgmr.msra.gmra.mrb[14].mxu0 %vm900_vm0, %v1636_v3 }
 0xf34   :  { %v1705_v4 = vpop.f32.mrb[14].mxu0 }
 0xf35   :  { %v2327_v6 = vadd.f32 %v2776_v37, %v1705_v4  ;;  %v1707_v8 = vpop.f32.mrb[15].mxu0  ;;  %v2287_v37 = vpack.c.bf16 %v1735_v22, %v1734_v21 }
 0xf36   :  { %v2329_v5 = vadd.f32 %v2778_v42, %v1707_v8  ;;  %v2290_v42 = vpack.c.bf16 %v1737_v31, %v1736_v26 }
 0xf37   :  { %v1870_v7 = vmul.f32 -1.442695, %v2327_v6  ;;  %2288 = vmatpush3.bf16.msra.mxu1 %v2287_v37 }
 0xf38   :  { %2289 = vmatprep.subr.bf16.mxu1 %v2617_v29  ;;  %v1871_v40 = vmul.f32 -1.442695, %v2329_v5 }
 0xf39   :  { %2476 = vpow2.f32 %v1870_v7 }
 0xf3a   :  { %2478 = vtanh.f32 %v2329_v5 }
 0xf3b   :  { %2291 = vmatpush3.bf16.msra.mxu1 %v2290_v42 }
 0xf3c   :  { %2292 = vmatprep.subr.bf16.mxu1 %v2617_v29 }
 0xf3f   :  { %2294 = vmatpush3.bf16.msra.mxu1 %v2293_v24 }
 0xf40   :  { %2295 = vmatprep.subr.bf16.mxu1 %v2617_v29 }
 0xf43   :  { %v2477_v12 = vpop.eup %2476  ;;  %2297 = vmatpush3.bf16.msra.mxu1 %v2296_v38 }
 0xf44   :  { %v1718_v14 = vadd.f32 1.0, %v2477_v12  ;;  %v2479_v16 = vpop.eup %2478 }
 0xf46   :  { %2480 = vrcp.f32 %v1718_v14 }
 0xf47   :  { %2482 = vpow2.f32 %v1871_v40 }
 0xf50   :  { %v2481_v18 = vpop.eup %2480 }
 0xf51   :  { %v1726_v19 = vmul.f32 %v2481_v18, %v2479_v16  ;;  %v2483_v43 = vpop.eup %2482  ;;  %v1725_v10 = vmul.f32 %v2481_v18, %v1626_v1 }
 0xf52   :  { %v1719_v44 = vadd.f32 1.0, %v2483_v43 }
 0xf53   :  { %1728 = vrot.lane.b32.xlu0 %v1726_v19, %s2611_s21 }
 0xf54   :  { %2484 = vrcp.f32 %v1719_v44 }
 0xf5e   :  { %v2485_v13 = vpop.eup %2484 }
 0xfc5   :  { %v1729_v23 = vpop.permute.xlu0 %1728 }
 0xfc6   :  { %v1731_v45 = vadd.f32 %v1729_v23, %v1725_v10 }
 0xfc8   :  { %2486 = vtanh.f32 %v1731_v45 }
 0xfd2   :  { %v2487_v46 = vpop.eup %2486 }
 0xfd3   :  { %v1733_v47 = vmul.f32 %v2487_v46, %v2485_v13 }
 0xfd5   :  { %1750 = vrot.lane.b32.xlu1 %v1733_v47, %s2611_s21 }
0x1047   :  { %v1751_v48 = vpop.permute.xlu1 %1750 }
0x1048   :  { %1900 = vmatmul.mubr.msk.f32.vlgmr.msra.gmra.mrb[16].mxu1 %vm900_vm0, %v1751_v48 }
0x111b   :  { %v1820_v51 = vpop.f32.mrb[16].mxu1 }
0x111c   :  { %v1821_v58 = vadd.f32 %v1872_v49, %v1820_v51  ;;  %v1901_v52 = vpop.f32.mrb[17].mxu1 }
0x111e   :  { %1824 = vst [vmem:[#allocation11] sm:$0xff] %v1821_v58 }
0x111f   :  { %2587 = shalt.err (!%p2584_p8)
}
0x1120   :  { %s2588_s30 = scalar_lea.hbm %s2891_s6, 128 }
0x1121   :  { %p2589_p9 = scmp.ne.s32.totalorder %s2891_s6, %s2588_s30  ;;  %p2592_p10 = scmp.lt.u32.totalorder %s2588_s30, %s2891_s6 }
0x1123   :  { %p2594_p11 = pnand %p2592_p10, %p2589_p9 }
0x1125   :  { %2597 = shalt.err (!%p2594_p11)
}
0x1126   :  { %1834 = dma.vmem_to_hbm [thread:$0]  %s1832_s27, 128, %s2891_s6, [#allocation5]  }
0x1127   :  { %2604 = dma.done.wait [#allocation5], 128  }
0x1128   :  { %2605 = vsyncadd [#allocation5], 4294967168 }
0x1129   :  { %1838 = vsyncpa [#allocation4], 1 }
0x112a   :  { %1839 = vsyncpa [#allocation7], 1 }
0x112b   :  { %1840 = vsyncpa [#allocation10], 1 }
0x112c   :  { %1841 = vsyncpa [#allocation5], 1 }

</bundles_post_ra>
